<compile_context>
chip_gen: v5e
topology: v5e:2x2
jax: 0.10.0
libtpu: 0.0.40
codegen_flags: <defaults>
</compile_context>

<pallas_src>
import jax
import jax.numpy as jnp
from jax import lax
from jax.experimental import pallas as pl
from jax.experimental.pallas import tpu as pltpu


# ----------------------------------------------------------------------------
# Fused kernel: GRU recurrence over a tc-step time chunk + online-softmax
# attention pooling.  Persistent state (h, running max, denom, weighted acc)
# lives in VMEM scratch across the serial time-chunk grid axis.
# NOTE: the init/epilogue pattern requires the time axis to be the innermost
#       (last) grid dimension; do not reorder the grid.
# ----------------------------------------------------------------------------
def _gru_attnpool_fused_kernel(maxlen_ref, x_ref, lens_ref, w_ih_ref,
                               b_proj_ref, w_hh_ref, b_hn_ref, w_att_ref,
                               out_ref, gi_s, h_s, m_s, l_s, acc_s):
    b = pl.program_id(0)                        # batch-block index (parallel)
    c = pl.program_id(1)                        # time-chunk index (serial)
    nc = pl.num_programs(1)
    tc, bb, E = x_ref.shape                     # steps per chunk, batch block
    H = out_ref.shape[1]

    # ---- init persistent state at the first chunk of each batch block ------
    @pl.when(c == 0)
    def _():
        h_s[...] = jnp.zeros(h_s.shape, jnp.float32)
        m_s[...] = jnp.full(m_s.shape, -1e30, jnp.float32)
        l_s[...] = jnp.zeros(l_s.shape, jnp.float32)
        acc_s[...] = jnp.zeros(acc_s.shape, jnp.float32)

    # ---- skip whole chunks past the longest real sequence in this block ----
    # (masked steps contribute 0 to the pool, so skipping them is exact)
    @pl.when(c * tc < maxlen_ref[b])
    def _():
        # -- chunk prologue: hoisted input projection (off the serial path) --
        # One tall-M MXU matmul for the whole chunk; gi written time-major so
        # per-step reads are leading-dim indexed (bb, 3H) tiles.
        w_ih = w_ih_ref[...]                    # (E, 3H), mxu dtype
        xm = (x_ref[...].astype(jnp.float32)    # reshape in f32 (safe layout)
              .reshape(tc * bb, E)
              .astype(w_ih.dtype))              # cast for bf16 MXU path
        y = jnp.dot(xm, w_ih, preferred_element_type=jnp.float32)
        y = y + b_proj_ref[...]                 # (tc*bb, 3H) f32
        gi_s[...] = y.reshape(tc, bb, 3 * H)

        w_hh = w_hh_ref[...]                    # (H, 3H) gate-major, mxu dtype
        b_hn = b_hn_ref[...]                    # (1, H) f32
        w_att = w_att_ref[...]                  # (1, H) f32
        lens = lens_ref[...]                    # (bb, 1) int32
        t0 = c * tc                             # global time offset of chunk

        # -- serial recurrence over the chunk + online-softmax attention -----
        def step(t, carry):
            h, m, l, acc = carry
            # ONE fused (bb,H)@(H,3H) dot per step (r|z|n lane-concatenated).
            gh = jnp.dot(h.astype(w_hh.dtype), w_hh,
                         preferred_element_type=jnp.float32)        # (bb, 3H)
            gi_t = gi_s[t]                                           # (bb, 3H)
            rz = jax.nn.sigmoid(gi_t[:, :2 * H] + gh[:, :2 * H])     # (bb, 2H)
            r = rz[:, :H]
            z = rz[:, H:]
            n = jnp.tanh(gi_t[:, 2 * H:] + r * (gh[:, 2 * H:] + b_hn))
            h_new = (1.0 - z) * n + z * h

            # attention-pool online-softmax update
            s = jnp.sum(h_new * w_att, axis=-1, keepdims=True)       # (bb, 1)
            valid = (t0 + t) < lens                                  # (bb, 1)
            s_m = jnp.where(valid, s, -1e30)
            m_new = jnp.maximum(m, s_m)
            scale = jnp.exp(m - m_new)
            p = jnp.where(valid, jnp.exp(s_m - m_new), 0.0)
            l_new = scale * l + p
            acc_new = scale * acc + p * h_new
            return h_new, m_new, l_new, acc_new

        carry0 = (h_s[...], m_s[...], l_s[...], acc_s[...])
        h, m, l, acc = lax.fori_loop(0, tc, step, carry0,
                                     unroll=min(8, tc))   # capped unroll
        h_s[...] = h
        m_s[...] = m
        l_s[...] = l
        acc_s[...] = acc

    # ---- epilogue: normalize once and emit the pooled output ---------------
    @pl.when(c == nc - 1)
    def _():
        l_safe = jnp.maximum(l_s[...], 1e-30)   # guard seq_len == 0
        out_ref[...] = (acc_s[...] * pl.reciprocal(l_safe, approx=False)
                        ).astype(out_ref.dtype)


# ----------------------------------------------------------------------------
# Wrapper: SingleDomainNet forward (text datasource branch), eval mode.
# ----------------------------------------------------------------------------
def _num_tensorcores():
    """Best-effort TensorCore count of the local part (1 on v5e/v6e)."""
    try:
        dev = jax.devices()[0]
        n = getattr(dev, "num_cores", None)
        if n:
            return int(n)
        kind = str(getattr(dev, "device_kind", "")).lower()
        if any(tag in kind for tag in ("v4", "v5p", "v7")):
            return 2
    except Exception:
        pass
    return 1


def single_domain_net_forward(x_bte, seq_lens, params, *, time_chunk=8,
                              mxu_dtype=jnp.float32, vmem_limit_bytes=None):
    """Fused GRU + AttentionPool forward.  x_bte: (B, T, E) batch-first."""
    B, T, E = x_bte.shape
    H = params["b_hn"].shape[-1]
    tc = max(1, min(time_chunk, T))
    n_chunks = -(-T // tc)
    T_pad = n_chunks * tc

    # Layout plumbing: time-major input so the chunk projection is one
    # contiguous tall-M matmul and per-step gi reads are leading-dim indexed.
    x_tbe = jnp.transpose(x_bte.astype(jnp.float32), (1, 0, 2))
    if T_pad != T:
        x_tbe = jnp.pad(x_tbe, ((0, T_pad - T), (0, 0), (0, 0)))
    x_tbe = x_tbe.astype(mxu_dtype)

    # Batch split only when there are really 2 TensorCores to shard onto and
    # the per-core block keeps full (>=8) sublanes; otherwise splitting just
    # doubles the serial grid overhead on 1-TC v5e/v6e.
    if _num_tensorcores() >= 2 and B % 2 == 0 and (B // 2) % 8 == 0:
        bb = B // 2
    else:
        bb = B
    nb = B // bb
    nc = T_pad // tc

    lens = seq_lens.reshape(B, 1).astype(jnp.int32)
    # Per batch-block longest real sequence (scalar-prefetched -> chunk skip).
    maxlen = jnp.maximum(jnp.max(lens.reshape(nb, bb), axis=1), 1)
    maxlen = maxlen.astype(jnp.int32)                               # (nb,)

    w_ih = params["w_ih_t"].astype(mxu_dtype)                       # (E, 3H)
    w_hh = params["w_hh_cat"].astype(mxu_dtype)                     # (H, 3H)

    grid_spec = pltpu.PrefetchScalarGridSpec(
        num_scalar_prefetch=1,          # maxlen -> SMEM
        grid=(nb, nc),
        in_specs=[
            pl.BlockSpec((tc, bb, E), lambda b, c, ml: (c, b, 0)),  # x chunk
            pl.BlockSpec((bb, 1), lambda b, c, ml: (b, 0)),         # seq_lens
            pl.BlockSpec((E, 3 * H), lambda b, c, ml: (0, 0)),      # W_ih^T
            pl.BlockSpec((1, 3 * H), lambda b, c, ml: (0, 0)),      # fused bias
            pl.BlockSpec((H, 3 * H), lambda b, c, ml: (0, 0)),      # W_hh^T cat
            pl.BlockSpec((1, H), lambda b, c, ml: (0, 0)),          # b_hn
            pl.BlockSpec((1, H), lambda b, c, ml: (0, 0)),          # w_att
        ],
        out_specs=pl.BlockSpec((bb, H), lambda b, c, ml: (b, 0)),
        scratch_shapes=[
            # gi chunk, time-major.  NOTE: at deployment keep bb >= 8 and H a
            # multiple of 128 so the (bb, 3H) tiles are unpadded; switch this
            # scratch to bf16 if VMEM-budget-bound (v7x: 64 MiB total).
            pltpu.VMEM((tc, bb, 3 * H), jnp.float32),
            pltpu.VMEM((bb, H), jnp.float32),   # GRU hidden state
            pltpu.VMEM((bb, 1), jnp.float32),   # running softmax max
            pltpu.VMEM((bb, 1), jnp.float32),   # running softmax denom
            pltpu.VMEM((bb, H), jnp.float32),   # weighted-sum accumulator
        ],
    )

    return pl.pallas_call(
        _gru_attnpool_fused_kernel,
        out_shape=jax.ShapeDtypeStruct((B, H), jnp.float32),
        grid_spec=grid_spec,
        compiler_params=pltpu.CompilerParams(
            dimension_semantics=("parallel", "arbitrary"),
            vmem_limit_bytes=vmem_limit_bytes),
    )(maxlen, x_tbe, lens, w_ih, params["b_proj"], w_hh,
      params["b_hn"], params["w_att"])


# ----------------------------------------------------------------------------
# Parameter preparation: PyTorch GRU / AttentionPool layout -> kernel layout.
# Gate order (r, z, n) is the PyTorch convention; checkpoint loaders must feed
# PyTorch-layout tensors here.
# ----------------------------------------------------------------------------
def prepare_params(weight_ih, weight_hh, bias_ih, bias_hh, att_w):
    """PyTorch layout (gate order r, z, n):
         weight_ih: (3H, E)   weight_hh: (3H, H)
         bias_ih:   (3H,)     bias_hh:   (3H,)
         att_w:     (H,)      AttentionPool scoring vector (its bias cancels
                              inside the softmax, so it is dropped).
    """
    three_h = weight_ih.shape[0]
    H = three_h // 3
    weight_ih = jnp.asarray(weight_ih, jnp.float32)
    weight_hh = jnp.asarray(weight_hh, jnp.float32)
    b_ih = jnp.asarray(bias_ih, jnp.float32).reshape(1, 3 * H)
    b_hh = jnp.asarray(bias_hh, jnp.float32).reshape(1, 3 * H)

    w_ih_t = weight_ih.T                      # (E, 3H)  lanes = [r | z | n]
    w_hh_cat = weight_hh.T                    # (H, 3H)  lanes = [r | z | n]
    # r/z biases fold together; n keeps b_ih only (b_hn applied inside r*(...)).
    b_proj = jnp.concatenate(
        [b_ih[:, :2 * H] + b_hh[:, :2 * H], b_ih[:, 2 * H:]], axis=1)  # (1,3H)
    b_hn = b_hh[:, 2 * H:]                                             # (1, H)
    w_att = jnp.asarray(att_w, jnp.float32).reshape(1, H)
    return {"w_ih_t": w_ih_t, "w_hh_cat": w_hh_cat, "b_proj": b_proj,
            "b_hn": b_hn, "w_att": w_att}


# ----------------------------------------------------------------------------
# Pure-JAX reference (PyTorch GRU equations + masked attention pooling).
# ----------------------------------------------------------------------------
def _reference_forward(x_bte, seq_lens, weight_ih, weight_hh, bias_ih,
                       bias_hh, att_w):
    x_tbe = jnp.transpose(x_bte, (1, 0, 2)).astype(jnp.float32)
    T, B, _ = x_tbe.shape
    H = weight_hh.shape[1]
    w_ih_t = weight_ih.T
    w_hh_t = weight_hh.T
    b_ih = bias_ih.reshape(1, 3 * H)
    b_hh = bias_hh.reshape(1, 3 * H)

    def step(h_prev, x_t):
        gi = x_t @ w_ih_t + b_ih
        gh = h_prev @ w_hh_t + b_hh
        r = jax.nn.sigmoid(gi[:, :H] + gh[:, :H])
        z = jax.nn.sigmoid(gi[:, H:2 * H] + gh[:, H:2 * H])
        n = jnp.tanh(gi[:, 2 * H:] + r * gh[:, 2 * H:])
        h = (1.0 - z) * n + z * h_prev
        return h, h

    _, h_all = lax.scan(step, jnp.zeros((B, H), jnp.float32), x_tbe)  # (T,B,H)
    w_att = att_w.reshape(1, H)
    scores = jnp.sum(h_all * w_att[None, :, :], axis=-1)              # (T, B)
    mask = jnp.arange(T)[:, None] < seq_lens[None, :]
    scores = jnp.where(mask, scores, -1e30)
    alpha = jax.nn.softmax(scores, axis=0) * mask
    alpha = alpha / jnp.sum(alpha, axis=0, keepdims=True)
    return jnp.sum(alpha[:, :, None] * h_all, axis=0)                 # (B, H)


if __name__ == "__main__":
    # small shapes: batch=2, seq=16 (two time chunks of 8), embedding_size=16,
    # units(hidden)=32
    B, T, E, H = 2, 16, 16, 32

    key = jax.random.PRNGKey(0)
    k = jax.random.split(key, 6)
    bound = 1.0 / (H ** 0.5)   # PyTorch GRU init: U(-1/sqrt(H), 1/sqrt(H))

    # PyTorch-layout parameters (gate order r, z, n)
    weight_ih = jax.random.uniform(k[0], (3 * H, E), jnp.float32, -bound, bound)
    weight_hh = jax.random.uniform(k[1], (3 * H, H), jnp.float32, -bound, bound)
    bias_ih = jax.random.uniform(k[2], (3 * H,), jnp.float32, -bound, bound)
    bias_hh = jax.random.uniform(k[3], (3 * H,), jnp.float32, -bound, bound)
    att_w = jax.random.uniform(k[4], (H,), jnp.float32, -bound, bound)

    x = jax.random.normal(k[5], (B, T, E), jnp.float32)     # batch-first input
    params = prepare_params(weight_ih, weight_hh, bias_ih, bias_hh, att_w)

    # Case 1: full-length sequences, f32 MXU path (tight check).
    seq_lens_a = jnp.array([T, T - 5], dtype=jnp.int32)     # seq_len >= 1
    out_a = jax.block_until_ready(
        single_domain_net_forward(x, seq_lens_a, params, time_chunk=8))
    ref_a = _reference_forward(x, seq_lens_a, weight_ih, weight_hh, bias_ih,
                               bias_hh, att_w)
    assert out_a.shape == (B, H)
    assert jnp.allclose(out_a, ref_a, rtol=1e-3, atol=1e-3), "f32 mismatch (full)"

    # Case 2: short sequences -> the second time chunk is skipped entirely.
    seq_lens_b = jnp.array([T // 2, T // 2 - 3], dtype=jnp.int32)
    out_b = jax.block_until_ready(
        single_domain_net_forward(x, seq_lens_b, params, time_chunk=8))
    ref_b = _reference_forward(x, seq_lens_b, weight_ih, weight_hh, bias_ih,
                               bias_hh, att_w)
    assert jnp.allclose(out_b, ref_b, rtol=1e-3, atol=1e-3), "f32 mismatch (skip)"

    # Case 3: bf16 MXU operands (deployment path), f32 accumulation/gates.
    out_c = jax.block_until_ready(
        single_domain_net_forward(x, seq_lens_a, params, time_chunk=8,
                                  mxu_dtype=jnp.bfloat16))
    assert jnp.allclose(out_c, ref_a, rtol=3e-2, atol=3e-2), "bf16 mismatch"

    print("KERNEL_OK")
</pallas_src>

<mosaic_0001>
module attributes {stable_mosaic.version = 11 : i64} {
  func.func @_gru_attnpool_fused_kernel(%arg0: i32, %arg1: i32, %arg2: memref<1xi32, #tpu.memory_space<smem>>, %arg3: memref<8x2x16xf32, #tpu.memory_space<vmem>>, %arg4: memref<2x1xi32, #tpu.memory_space<vmem>>, %arg5: memref<16x96xf32, #tpu.memory_space<vmem>>, %arg6: memref<1x96xf32, #tpu.memory_space<vmem>>, %arg7: memref<32x96xf32, #tpu.memory_space<vmem>>, %arg8: memref<1x32xf32, #tpu.memory_space<vmem>>, %arg9: memref<1x32xf32, #tpu.memory_space<vmem>>, %arg10: memref<2x32xf32, #tpu.memory_space<vmem>>, %arg11: memref<8x2x96xf32, #tpu.memory_space<vmem>>, %arg12: memref<2x32xf32, #tpu.memory_space<vmem>>, %arg13: memref<2x1xf32, #tpu.memory_space<vmem>>, %arg14: memref<2x1xf32, #tpu.memory_space<vmem>>, %arg15: memref<2x32xf32, #tpu.memory_space<vmem>>) attributes {dimension_semantics = [#tpu.dimension_semantics<parallel>, #tpu.dimension_semantics<arbitrary>], iteration_bounds = array<i64: 1, 2>, scalar_prefetch = 1 : i64, scratch_operands = 5 : i64, tpu.core_type = #tpu.core_type<tc>, window_params = [{transform_indices = @transform_0, window_bounds = array<i64: 8, 2, 16>}, {transform_indices = @transform_1, window_bounds = array<i64: 2, 1>}, {pipeline_mode = #tpu.pipeline_mode<synchronous>, transform_indices = @transform_2, window_bounds = array<i64: 16, 96>}, {pipeline_mode = #tpu.pipeline_mode<synchronous>, transform_indices = @transform_3, window_bounds = array<i64: 1, 96>}, {pipeline_mode = #tpu.pipeline_mode<synchronous>, transform_indices = @transform_4, window_bounds = array<i64: 32, 96>}, {pipeline_mode = #tpu.pipeline_mode<synchronous>, transform_indices = @transform_5, window_bounds = array<i64: 1, 32>}, {pipeline_mode = #tpu.pipeline_mode<synchronous>, transform_indices = @transform_6, window_bounds = array<i64: 1, 32>}, {transform_indices = @transform_7, window_bounds = array<i64: 2, 32>}]} {
    %c0_i32 = arith.constant 0 : i32
    %0 = arith.cmpi eq, %arg1, %c0_i32 : i32
    %1 = arith.extui %0 : i1 to i32
    %c0_i32_0 = arith.constant 0 : i32
    %2 = arith.cmpi ne, %1, %c0_i32_0 : i32
    scf.if %2 {
      %cst = arith.constant 0.000000e+00 : f32
      %12 = vector.broadcast %cst : f32 to vector<2x32xf32>
      %c0 = arith.constant 0 : index
      %c0_3 = arith.constant 0 : index
      %13 = vector.load %arg12[%c0, %c0_3] : memref<2x32xf32, #tpu.memory_space<vmem>>, vector<2x32xf32>
      tpu.vector_store %arg12[%c0, %c0_3], %12 {strides = array<i32>} : memref<2x32xf32, #tpu.memory_space<vmem>>, vector<2x32xf32>,
      %cst_4 = arith.constant -1.000000e+30 : f32
      %14 = vector.broadcast %cst_4 : f32 to vector<2x1xf32>
      %c0_5 = arith.constant 0 : index
      %c0_6 = arith.constant 0 : index
      %15 = vector.load %arg13[%c0_5, %c0_6] : memref<2x1xf32, #tpu.memory_space<vmem>>, vector<2x1xf32>
      tpu.vector_store %arg13[%c0_5, %c0_6], %14 {strides = array<i32>} : memref<2x1xf32, #tpu.memory_space<vmem>>, vector<2x1xf32>,
      %cst_7 = arith.constant 0.000000e+00 : f32
      %16 = vector.broadcast %cst_7 : f32 to vector<2x1xf32>
      %c0_8 = arith.constant 0 : index
      %c0_9 = arith.constant 0 : index
      %17 = vector.load %arg14[%c0_8, %c0_9] : memref<2x1xf32, #tpu.memory_space<vmem>>, vector<2x1xf32>
      tpu.vector_store %arg14[%c0_8, %c0_9], %16 {strides = array<i32>} : memref<2x1xf32, #tpu.memory_space<vmem>>, vector<2x1xf32>,
      %cst_10 = arith.constant 0.000000e+00 : f32
      %18 = vector.broadcast %cst_10 : f32 to vector<2x32xf32>
      %c0_11 = arith.constant 0 : index
      %c0_12 = arith.constant 0 : index
      %19 = vector.load %arg15[%c0_11, %c0_12] : memref<2x32xf32, #tpu.memory_space<vmem>>, vector<2x32xf32>
      tpu.vector_store %arg15[%c0_11, %c0_12], %18 {strides = array<i32>} : memref<2x32xf32, #tpu.memory_space<vmem>>, vector<2x32xf32>,
    } else {
    }
    %c8_i32 = arith.constant 8 : i32
    %3 = arith.muli %arg1, %c8_i32 : i32
    %4 = arith.index_cast %arg0 : i32 to index
    %5 = memref.load %arg2[%4] : memref<1xi32, #tpu.memory_space<smem>>
    %6 = arith.cmpi slt, %3, %5 : i32
    %7 = arith.extui %6 : i1 to i32
    %c0_i32_1 = arith.constant 0 : i32
    %8 = arith.cmpi ne, %7, %c0_i32_1 : i32
    scf.if %8 {
      %c0 = arith.constant 0 : index
      %c0_3 = arith.constant 0 : index
      %12 = vector.load %arg5[%c0, %c0_3] : memref<16x96xf32, #tpu.memory_space<vmem>>, vector<16x96xf32>
      %c0_4 = arith.constant 0 : index
      %c0_5 = arith.constant 0 : index
      %c0_6 = arith.constant 0 : index
      %13 = vector.load %arg3[%c0_4, %c0_5, %c0_6] : memref<8x2x16xf32, #tpu.memory_space<vmem>>, vector<8x2x16xf32>
      %14 = vector.shape_cast %13 : vector<8x2x16xf32> to vector<16x16xf32>
      %cst = arith.constant dense<0.000000e+00> : vector<16x96xf32>
      %15 = tpu.matmul %14, %12, %cst {dimension_numbers = #tpu.dot_dimension_numbers<[1], [0], [0], [1], [0, 0, 1, 1], [], []>} : vector<16x16xf32>, vector<16x96xf32>, vector<16x96xf32> -> vector<16x96xf32>
      %c0_7 = arith.constant 0 : index
      %c0_8 = arith.constant 0 : index
      %16 = vector.load %arg6[%c0_7, %c0_8] : memref<1x96xf32, #tpu.memory_space<vmem>>, vector<1x96xf32>
      %17 = vector.broadcast %16 : vector<1x96xf32> to vector<16x96xf32>
      %18 = arith.addf %15, %17 : vector<16x96xf32>
      %19 = vector.shape_cast %18 : vector<16x96xf32> to vector<8x2x96xf32>
      %c0_9 = arith.constant 0 : index
      %c0_10 = arith.constant 0 : index
      %c0_11 = arith.constant 0 : index
      %20 = vector.load %arg11[%c0_9, %c0_10, %c0_11] : memref<8x2x96xf32, #tpu.memory_space<vmem>>, vector<8x2x96xf32>
      tpu.vector_store %arg11[%c0_9, %c0_10, %c0_11], %19 {strides = array<i32>} : memref<8x2x96xf32, #tpu.memory_space<vmem>>, vector<8x2x96xf32>,
      %c0_12 = arith.constant 0 : index
      %c0_13 = arith.constant 0 : index
      %21 = vector.load %arg7[%c0_12, %c0_13] : memref<32x96xf32, #tpu.memory_space<vmem>>, vector<32x96xf32>
      %c0_14 = arith.constant 0 : index
      %c0_15 = arith.constant 0 : index
      %22 = vector.load %arg8[%c0_14, %c0_15] : memref<1x32xf32, #tpu.memory_space<vmem>>, vector<1x32xf32>
      %c0_16 = arith.constant 0 : index
      %c0_17 = arith.constant 0 : index
      %23 = vector.load %arg9[%c0_16, %c0_17] : memref<1x32xf32, #tpu.memory_space<vmem>>, vector<1x32xf32>
      %c0_18 = arith.constant 0 : index
      %c0_19 = arith.constant 0 : index
      %24 = vector.load %arg4[%c0_18, %c0_19] : memref<2x1xi32, #tpu.memory_space<vmem>>, vector<2x1xi32>
      %c8_i32_20 = arith.constant 8 : i32
      %25 = arith.muli %arg1, %c8_i32_20 : i32
      %c0_21 = arith.constant 0 : index
      %c0_22 = arith.constant 0 : index
      %26 = vector.load %arg12[%c0_21, %c0_22] : memref<2x32xf32, #tpu.memory_space<vmem>>, vector<2x32xf32>
      %c0_23 = arith.constant 0 : index
      %c0_24 = arith.constant 0 : index
      %27 = vector.load %arg13[%c0_23, %c0_24] : memref<2x1xf32, #tpu.memory_space<vmem>>, vector<2x1xf32>
      %c0_25 = arith.constant 0 : index
      %c0_26 = arith.constant 0 : index
      %28 = vector.load %arg14[%c0_25, %c0_26] : memref<2x1xf32, #tpu.memory_space<vmem>>, vector<2x1xf32>
      %c0_27 = arith.constant 0 : index
      %c0_28 = arith.constant 0 : index
      %29 = vector.load %arg15[%c0_27, %c0_28] : memref<2x32xf32, #tpu.memory_space<vmem>>, vector<2x32xf32>
      %c0_i32_29 = arith.constant 0 : i32
      %cst_30 = arith.constant dense<0.000000e+00> : vector<2x96xf32>
      %30 = tpu.matmul %26, %21, %cst_30 {dimension_numbers = #tpu.dot_dimension_numbers<[1], [0], [0], [1], [0, 0, 1, 1], [], []>} : vector<2x32xf32>, vector<32x96xf32>, vector<2x96xf32> -> vector<2x96xf32>
      %31 = arith.index_cast %c0_i32_29 : i32 to index
      %c0_31 = arith.constant 0 : index
      %c0_32 = arith.constant 0 : index
      %32 = vector.load %arg11[%31, %c0_31, %c0_32] : memref<8x2x96xf32, #tpu.memory_space<vmem>>, vector<1x2x96xf32>
      %33 = vector.shape_cast %32 : vector<1x2x96xf32> to vector<2x96xf32>
      %34 = vector.extract_strided_slice %33 {offsets = [0, 0], sizes = [2, 64], strides = [1, 1]} : vector<2x96xf32> to vector<2x64xf32>
      %35 = vector.extract_strided_slice %30 {offsets = [0, 0], sizes = [2, 64], strides = [1, 1]} : vector<2x96xf32> to vector<2x64xf32>
      %36 = arith.addf %34, %35 : vector<2x64xf32>
      %37 = arith.negf %36 : vector<2x64xf32>
      %38 = math.exp %37 : vector<2x64xf32>
      %cst_33 = arith.constant 1.000000e+00 : f32
      %39 = vector.broadcast %cst_33 : f32 to vector<2x64xf32>
      %40 = arith.addf %39, %38 : vector<2x64xf32>
      %41 = arith.divf %39, %40 : vector<2x64xf32>
      %42 = vector.extract_strided_slice %41 {offsets = [0, 0], sizes = [2, 32], strides = [1, 1]} : vector<2x64xf32> to vector<2x32xf32>
      %43 = vector.extract_strided_slice %41 {offsets = [0, 32], sizes = [2, 32], strides = [1, 1]} : vector<2x64xf32> to vector<2x32xf32>
      %44 = vector.extract_strided_slice %33 {offsets = [0, 64], sizes = [2, 32], strides = [1, 1]} : vector<2x96xf32> to vector<2x32xf32>
      %45 = vector.extract_strided_slice %30 {offsets = [0, 64], sizes = [2, 32], strides = [1, 1]} : vector<2x96xf32> to vector<2x32xf32>
      %46 = vector.broadcast %22 : vector<1x32xf32> to vector<2x32xf32>
      %47 = arith.addf %45, %46 : vector<2x32xf32>
      %48 = arith.mulf %42, %47 : vector<2x32xf32>
      %49 = arith.addf %44, %48 : vector<2x32xf32>
      %50 = math.tanh %49 : vector<2x32xf32>
      %cst_34 = arith.constant 1.000000e+00 : f32
      %51 = vector.broadcast %cst_34 : f32 to vector<2x32xf32>
      %52 = arith.subf %51, %43 : vector<2x32xf32>
      %53 = arith.mulf %52, %50 : vector<2x32xf32>
      %54 = arith.mulf %43, %26 : vector<2x32xf32>
      %55 = arith.addf %53, %54 : vector<2x32xf32>
      %56 = vector.broadcast %23 : vector<1x32xf32> to vector<2x32xf32>
      %57 = arith.mulf %55, %56 : vector<2x32xf32>
      %cst_35 = arith.constant dense<0.000000e+00> : vector<2xf32>
      %58 = vector.multi_reduction <add>, %57, %cst_35 [1] : vector<2x32xf32> to vector<2xf32>
      %59 = vector.shape_cast %58 : vector<2xf32> to vector<2x1xf32>
      %60 = arith.addi %25, %c0_i32_29 : i32
      %61 = vector.broadcast %60 : i32 to vector<2x1xi32>
      %62 = arith.cmpi slt, %61, %24 : vector<2x1xi32>
      %cst_36 = arith.constant -1.000000e+30 : f32
      %63 = vector.broadcast %cst_36 : f32 to vector<2x1xf32>
      %64 = arith.select %62, %59, %63 : vector<2x1xi1>, vector<2x1xf32>
      %65 = arith.maximumf %27, %64 : vector<2x1xf32>
      %66 = arith.subf %27, %65 : vector<2x1xf32>
      %67 = math.exp %66 : vector<2x1xf32>
      %68 = arith.subf %64, %65 : vector<2x1xf32>
      %69 = math.exp %68 : vector<2x1xf32>
      %cst_37 = arith.constant 0.000000e+00 : f32
      %70 = vector.broadcast %cst_37 : f32 to vector<2x1xf32>
      %71 = arith.select %62, %69, %70 : vector<2x1xi1>, vector<2x1xf32>
      %72 = arith.mulf %67, %28 : vector<2x1xf32>
      %73 = arith.addf %72, %71 : vector<2x1xf32>
      %74 = vector.broadcast %67 : vector<2x1xf32> to vector<2x32xf32>
      %75 = arith.mulf %74, %29 : vector<2x32xf32>
      %76 = vector.broadcast %71 : vector<2x1xf32> to vector<2x32xf32>
      %77 = arith.mulf %76, %55 : vector<2x32xf32>
      %78 = arith.addf %75, %77 : vector<2x32xf32>
      %c1_i32_38 = arith.constant 1 : i32
      %cst_39 = arith.constant dense<0.000000e+00> : vector<2x96xf32>
      %79 = tpu.matmul %55, %21, %cst_39 {dimension_numbers = #tpu.dot_dimension_numbers<[1], [0], [0], [1], [0, 0, 1, 1], [], []>} : vector<2x32xf32>, vector<32x96xf32>, vector<2x96xf32> -> vector<2x96xf32>
      %80 = arith.index_cast %c1_i32_38 : i32 to index
      %c0_40 = arith.constant 0 : index
      %c0_41 = arith.constant 0 : index
      %81 = vector.load %arg11[%80, %c0_40, %c0_41] : memref<8x2x96xf32, #tpu.memory_space<vmem>>, vector<1x2x96xf32>
      %82 = vector.shape_cast %81 : vector<1x2x96xf32> to vector<2x96xf32>
      %83 = vector.extract_strided_slice %82 {offsets = [0, 0], sizes = [2, 64], strides = [1, 1]} : vector<2x96xf32> to vector<2x64xf32>
      %84 = vector.extract_strided_slice %79 {offsets = [0, 0], sizes = [2, 64], strides = [1, 1]} : vector<2x96xf32> to vector<2x64xf32>
      %85 = arith.addf %83, %84 : vector<2x64xf32>
      %86 = arith.negf %85 : vector<2x64xf32>
      %87 = math.exp %86 : vector<2x64xf32>
      %cst_42 = arith.constant 1.000000e+00 : f32
      %88 = vector.broadcast %cst_42 : f32 to vector<2x64xf32>
      %89 = arith.addf %88, %87 : vector<2x64xf32>
      %90 = arith.divf %88, %89 : vector<2x64xf32>
      %91 = vector.extract_strided_slice %90 {offsets = [0, 0], sizes = [2, 32], strides = [1, 1]} : vector<2x64xf32> to vector<2x32xf32>
      %92 = vector.extract_strided_slice %90 {offsets = [0, 32], sizes = [2, 32], strides = [1, 1]} : vector<2x64xf32> to vector<2x32xf32>
      %93 = vector.extract_strided_slice %82 {offsets = [0, 64], sizes = [2, 32], strides = [1, 1]} : vector<2x96xf32> to vector<2x32xf32>
      %94 = vector.extract_strided_slice %79 {offsets = [0, 64], sizes = [2, 32], strides = [1, 1]} : vector<2x96xf32> to vector<2x32xf32>
      %95 = vector.broadcast %22 : vector<1x32xf32> to vector<2x32xf32>
      %96 = arith.addf %94, %95 : vector<2x32xf32>
      %97 = arith.mulf %91, %96 : vector<2x32xf32>
      %98 = arith.addf %93, %97 : vector<2x32xf32>
      %99 = math.tanh %98 : vector<2x32xf32>
      %cst_43 = arith.constant 1.000000e+00 : f32
      %100 = vector.broadcast %cst_43 : f32 to vector<2x32xf32>
      %101 = arith.subf %100, %92 : vector<2x32xf32>
      %102 = arith.mulf %101, %99 : vector<2x32xf32>
      %103 = arith.mulf %92, %55 : vector<2x32xf32>
      %104 = arith.addf %102, %103 : vector<2x32xf32>
      %105 = vector.broadcast %23 : vector<1x32xf32> to vector<2x32xf32>
      %106 = arith.mulf %104, %105 : vector<2x32xf32>
      %cst_44 = arith.constant dense<0.000000e+00> : vector<2xf32>
      %107 = vector.multi_reduction <add>, %106, %cst_44 [1] : vector<2x32xf32> to vector<2xf32>
      %108 = vector.shape_cast %107 : vector<2xf32> to vector<2x1xf32>
      %109 = arith.addi %25, %c1_i32_38 : i32
      %110 = vector.broadcast %109 : i32 to vector<2x1xi32>
      %111 = arith.cmpi slt, %110, %24 : vector<2x1xi32>
      %cst_45 = arith.constant -1.000000e+30 : f32
      %112 = vector.broadcast %cst_45 : f32 to vector<2x1xf32>
      %113 = arith.select %111, %108, %112 : vector<2x1xi1>, vector<2x1xf32>
      %114 = arith.maximumf %65, %113 : vector<2x1xf32>
      %115 = arith.subf %65, %114 : vector<2x1xf32>
      %116 = math.exp %115 : vector<2x1xf32>
      %117 = arith.subf %113, %114 : vector<2x1xf32>
      %118 = math.exp %117 : vector<2x1xf32>
      %cst_46 = arith.constant 0.000000e+00 : f32
      %119 = vector.broadcast %cst_46 : f32 to vector<2x1xf32>
      %120 = arith.select %111, %118, %119 : vector<2x1xi1>, vector<2x1xf32>
      %121 = arith.mulf %116, %73 : vector<2x1xf32>
      %122 = arith.addf %121, %120 : vector<2x1xf32>
      %123 = vector.broadcast %116 : vector<2x1xf32> to vector<2x32xf32>
      %124 = arith.mulf %123, %78 : vector<2x32xf32>
      %125 = vector.broadcast %120 : vector<2x1xf32> to vector<2x32xf32>
      %126 = arith.mulf %125, %104 : vector<2x32xf32>
      %127 = arith.addf %124, %126 : vector<2x32xf32>
      %c2_i32 = arith.constant 2 : i32
      %cst_47 = arith.constant dense<0.000000e+00> : vector<2x96xf32>
      %128 = tpu.matmul %104, %21, %cst_47 {dimension_numbers = #tpu.dot_dimension_numbers<[1], [0], [0], [1], [0, 0, 1, 1], [], []>} : vector<2x32xf32>, vector<32x96xf32>, vector<2x96xf32> -> vector<2x96xf32>
      %129 = arith.index_cast %c2_i32 : i32 to index
      %c0_48 = arith.constant 0 : index
      %c0_49 = arith.constant 0 : index
      %130 = vector.load %arg11[%129, %c0_48, %c0_49] : memref<8x2x96xf32, #tpu.memory_space<vmem>>, vector<1x2x96xf32>
      %131 = vector.shape_cast %130 : vector<1x2x96xf32> to vector<2x96xf32>
      %132 = vector.extract_strided_slice %131 {offsets = [0, 0], sizes = [2, 64], strides = [1, 1]} : vector<2x96xf32> to vector<2x64xf32>
      %133 = vector.extract_strided_slice %128 {offsets = [0, 0], sizes = [2, 64], strides = [1, 1]} : vector<2x96xf32> to vector<2x64xf32>
      %134 = arith.addf %132, %133 : vector<2x64xf32>
      %135 = arith.negf %134 : vector<2x64xf32>
      %136 = math.exp %135 : vector<2x64xf32>
      %cst_50 = arith.constant 1.000000e+00 : f32
      %137 = vector.broadcast %cst_50 : f32 to vector<2x64xf32>
      %138 = arith.addf %137, %136 : vector<2x64xf32>
      %139 = arith.divf %137, %138 : vector<2x64xf32>
      %140 = vector.extract_strided_slice %139 {offsets = [0, 0], sizes = [2, 32], strides = [1, 1]} : vector<2x64xf32> to vector<2x32xf32>
      %141 = vector.extract_strided_slice %139 {offsets = [0, 32], sizes = [2, 32], strides = [1, 1]} : vector<2x64xf32> to vector<2x32xf32>
      %142 = vector.extract_strided_slice %131 {offsets = [0, 64], sizes = [2, 32], strides = [1, 1]} : vector<2x96xf32> to vector<2x32xf32>
      %143 = vector.extract_strided_slice %128 {offsets = [0, 64], sizes = [2, 32], strides = [1, 1]} : vector<2x96xf32> to vector<2x32xf32>
      %144 = vector.broadcast %22 : vector<1x32xf32> to vector<2x32xf32>
      %145 = arith.addf %143, %144 : vector<2x32xf32>
      %146 = arith.mulf %140, %145 : vector<2x32xf32>
      %147 = arith.addf %142, %146 : vector<2x32xf32>
      %148 = math.tanh %147 : vector<2x32xf32>
      %cst_51 = arith.constant 1.000000e+00 : f32
      %149 = vector.broadcast %cst_51 : f32 to vector<2x32xf32>
      %150 = arith.subf %149, %141 : vector<2x32xf32>
      %151 = arith.mulf %150, %148 : vector<2x32xf32>
      %152 = arith.mulf %141, %104 : vector<2x32xf32>
      %153 = arith.addf %151, %152 : vector<2x32xf32>
      %154 = vector.broadcast %23 : vector<1x32xf32> to vector<2x32xf32>
      %155 = arith.mulf %153, %154 : vector<2x32xf32>
      %cst_52 = arith.constant dense<0.000000e+00> : vector<2xf32>
      %156 = vector.multi_reduction <add>, %155, %cst_52 [1] : vector<2x32xf32> to vector<2xf32>
      %157 = vector.shape_cast %156 : vector<2xf32> to vector<2x1xf32>
      %158 = arith.addi %25, %c2_i32 : i32
      %159 = vector.broadcast %158 : i32 to vector<2x1xi32>
      %160 = arith.cmpi slt, %159, %24 : vector<2x1xi32>
      %cst_53 = arith.constant -1.000000e+30 : f32
      %161 = vector.broadcast %cst_53 : f32 to vector<2x1xf32>
      %162 = arith.select %160, %157, %161 : vector<2x1xi1>, vector<2x1xf32>
      %163 = arith.maximumf %114, %162 : vector<2x1xf32>
      %164 = arith.subf %114, %163 : vector<2x1xf32>
      %165 = math.exp %164 : vector<2x1xf32>
      %166 = arith.subf %162, %163 : vector<2x1xf32>
      %167 = math.exp %166 : vector<2x1xf32>
      %cst_54 = arith.constant 0.000000e+00 : f32
      %168 = vector.broadcast %cst_54 : f32 to vector<2x1xf32>
      %169 = arith.select %160, %167, %168 : vector<2x1xi1>, vector<2x1xf32>
      %170 = arith.mulf %165, %122 : vector<2x1xf32>
      %171 = arith.addf %170, %169 : vector<2x1xf32>
      %172 = vector.broadcast %165 : vector<2x1xf32> to vector<2x32xf32>
      %173 = arith.mulf %172, %127 : vector<2x32xf32>
      %174 = vector.broadcast %169 : vector<2x1xf32> to vector<2x32xf32>
      %175 = arith.mulf %174, %153 : vector<2x32xf32>
      %176 = arith.addf %173, %175 : vector<2x32xf32>
      %c3_i32 = arith.constant 3 : i32
      %cst_55 = arith.constant dense<0.000000e+00> : vector<2x96xf32>
      %177 = tpu.matmul %153, %21, %cst_55 {dimension_numbers = #tpu.dot_dimension_numbers<[1], [0], [0], [1], [0, 0, 1, 1], [], []>} : vector<2x32xf32>, vector<32x96xf32>, vector<2x96xf32> -> vector<2x96xf32>
      %178 = arith.index_cast %c3_i32 : i32 to index
      %c0_56 = arith.constant 0 : index
      %c0_57 = arith.constant 0 : index
      %179 = vector.load %arg11[%178, %c0_56, %c0_57] : memref<8x2x96xf32, #tpu.memory_space<vmem>>, vector<1x2x96xf32>
      %180 = vector.shape_cast %179 : vector<1x2x96xf32> to vector<2x96xf32>
      %181 = vector.extract_strided_slice %180 {offsets = [0, 0], sizes = [2, 64], strides = [1, 1]} : vector<2x96xf32> to vector<2x64xf32>
      %182 = vector.extract_strided_slice %177 {offsets = [0, 0], sizes = [2, 64], strides = [1, 1]} : vector<2x96xf32> to vector<2x64xf32>
      %183 = arith.addf %181, %182 : vector<2x64xf32>
      %184 = arith.negf %183 : vector<2x64xf32>
      %185 = math.exp %184 : vector<2x64xf32>
      %cst_58 = arith.constant 1.000000e+00 : f32
      %186 = vector.broadcast %cst_58 : f32 to vector<2x64xf32>
      %187 = arith.addf %186, %185 : vector<2x64xf32>
      %188 = arith.divf %186, %187 : vector<2x64xf32>
      %189 = vector.extract_strided_slice %188 {offsets = [0, 0], sizes = [2, 32], strides = [1, 1]} : vector<2x64xf32> to vector<2x32xf32>
      %190 = vector.extract_strided_slice %188 {offsets = [0, 32], sizes = [2, 32], strides = [1, 1]} : vector<2x64xf32> to vector<2x32xf32>
      %191 = vector.extract_strided_slice %180 {offsets = [0, 64], sizes = [2, 32], strides = [1, 1]} : vector<2x96xf32> to vector<2x32xf32>
      %192 = vector.extract_strided_slice %177 {offsets = [0, 64], sizes = [2, 32], strides = [1, 1]} : vector<2x96xf32> to vector<2x32xf32>
      %193 = vector.broadcast %22 : vector<1x32xf32> to vector<2x32xf32>
      %194 = arith.addf %192, %193 : vector<2x32xf32>
      %195 = arith.mulf %189, %194 : vector<2x32xf32>
      %196 = arith.addf %191, %195 : vector<2x32xf32>
      %197 = math.tanh %196 : vector<2x32xf32>
      %cst_59 = arith.constant 1.000000e+00 : f32
      %198 = vector.broadcast %cst_59 : f32 to vector<2x32xf32>
      %199 = arith.subf %198, %190 : vector<2x32xf32>
      %200 = arith.mulf %199, %197 : vector<2x32xf32>
      %201 = arith.mulf %190, %153 : vector<2x32xf32>
      %202 = arith.addf %200, %201 : vector<2x32xf32>
      %203 = vector.broadcast %23 : vector<1x32xf32> to vector<2x32xf32>
      %204 = arith.mulf %202, %203 : vector<2x32xf32>
      %cst_60 = arith.constant dense<0.000000e+00> : vector<2xf32>
      %205 = vector.multi_reduction <add>, %204, %cst_60 [1] : vector<2x32xf32> to vector<2xf32>
      %206 = vector.shape_cast %205 : vector<2xf32> to vector<2x1xf32>
      %207 = arith.addi %25, %c3_i32 : i32
      %208 = vector.broadcast %207 : i32 to vector<2x1xi32>
      %209 = arith.cmpi slt, %208, %24 : vector<2x1xi32>
      %cst_61 = arith.constant -1.000000e+30 : f32
      %210 = vector.broadcast %cst_61 : f32 to vector<2x1xf32>
      %211 = arith.select %209, %206, %210 : vector<2x1xi1>, vector<2x1xf32>
      %212 = arith.maximumf %163, %211 : vector<2x1xf32>
      %213 = arith.subf %163, %212 : vector<2x1xf32>
      %214 = math.exp %213 : vector<2x1xf32>
      %215 = arith.subf %211, %212 : vector<2x1xf32>
      %216 = math.exp %215 : vector<2x1xf32>
      %cst_62 = arith.constant 0.000000e+00 : f32
      %217 = vector.broadcast %cst_62 : f32 to vector<2x1xf32>
      %218 = arith.select %209, %216, %217 : vector<2x1xi1>, vector<2x1xf32>
      %219 = arith.mulf %214, %171 : vector<2x1xf32>
      %220 = arith.addf %219, %218 : vector<2x1xf32>
      %221 = vector.broadcast %214 : vector<2x1xf32> to vector<2x32xf32>
      %222 = arith.mulf %221, %176 : vector<2x32xf32>
      %223 = vector.broadcast %218 : vector<2x1xf32> to vector<2x32xf32>
      %224 = arith.mulf %223, %202 : vector<2x32xf32>
      %225 = arith.addf %222, %224 : vector<2x32xf32>
      %c4_i32 = arith.constant 4 : i32
      %cst_63 = arith.constant dense<0.000000e+00> : vector<2x96xf32>
      %226 = tpu.matmul %202, %21, %cst_63 {dimension_numbers = #tpu.dot_dimension_numbers<[1], [0], [0], [1], [0, 0, 1, 1], [], []>} : vector<2x32xf32>, vector<32x96xf32>, vector<2x96xf32> -> vector<2x96xf32>
      %227 = arith.index_cast %c4_i32 : i32 to index
      %c0_64 = arith.constant 0 : index
      %c0_65 = arith.constant 0 : index
      %228 = vector.load %arg11[%227, %c0_64, %c0_65] : memref<8x2x96xf32, #tpu.memory_space<vmem>>, vector<1x2x96xf32>
      %229 = vector.shape_cast %228 : vector<1x2x96xf32> to vector<2x96xf32>
      %230 = vector.extract_strided_slice %229 {offsets = [0, 0], sizes = [2, 64], strides = [1, 1]} : vector<2x96xf32> to vector<2x64xf32>
      %231 = vector.extract_strided_slice %226 {offsets = [0, 0], sizes = [2, 64], strides = [1, 1]} : vector<2x96xf32> to vector<2x64xf32>
      %232 = arith.addf %230, %231 : vector<2x64xf32>
      %233 = arith.negf %232 : vector<2x64xf32>
      %234 = math.exp %233 : vector<2x64xf32>
      %cst_66 = arith.constant 1.000000e+00 : f32
      %235 = vector.broadcast %cst_66 : f32 to vector<2x64xf32>
      %236 = arith.addf %235, %234 : vector<2x64xf32>
      %237 = arith.divf %235, %236 : vector<2x64xf32>
      %238 = vector.extract_strided_slice %237 {offsets = [0, 0], sizes = [2, 32], strides = [1, 1]} : vector<2x64xf32> to vector<2x32xf32>
      %239 = vector.extract_strided_slice %237 {offsets = [0, 32], sizes = [2, 32], strides = [1, 1]} : vector<2x64xf32> to vector<2x32xf32>
      %240 = vector.extract_strided_slice %229 {offsets = [0, 64], sizes = [2, 32], strides = [1, 1]} : vector<2x96xf32> to vector<2x32xf32>
      %241 = vector.extract_strided_slice %226 {offsets = [0, 64], sizes = [2, 32], strides = [1, 1]} : vector<2x96xf32> to vector<2x32xf32>
      %242 = vector.broadcast %22 : vector<1x32xf32> to vector<2x32xf32>
      %243 = arith.addf %241, %242 : vector<2x32xf32>
      %244 = arith.mulf %238, %243 : vector<2x32xf32>
      %245 = arith.addf %240, %244 : vector<2x32xf32>
      %246 = math.tanh %245 : vector<2x32xf32>
      %cst_67 = arith.constant 1.000000e+00 : f32
      %247 = vector.broadcast %cst_67 : f32 to vector<2x32xf32>
      %248 = arith.subf %247, %239 : vector<2x32xf32>
      %249 = arith.mulf %248, %246 : vector<2x32xf32>
      %250 = arith.mulf %239, %202 : vector<2x32xf32>
      %251 = arith.addf %249, %250 : vector<2x32xf32>
      %252 = vector.broadcast %23 : vector<1x32xf32> to vector<2x32xf32>
      %253 = arith.mulf %251, %252 : vector<2x32xf32>
      %cst_68 = arith.constant dense<0.000000e+00> : vector<2xf32>
      %254 = vector.multi_reduction <add>, %253, %cst_68 [1] : vector<2x32xf32> to vector<2xf32>
      %255 = vector.shape_cast %254 : vector<2xf32> to vector<2x1xf32>
      %256 = arith.addi %25, %c4_i32 : i32
      %257 = vector.broadcast %256 : i32 to vector<2x1xi32>
      %258 = arith.cmpi slt, %257, %24 : vector<2x1xi32>
      %cst_69 = arith.constant -1.000000e+30 : f32
      %259 = vector.broadcast %cst_69 : f32 to vector<2x1xf32>
      %260 = arith.select %258, %255, %259 : vector<2x1xi1>, vector<2x1xf32>
      %261 = arith.maximumf %212, %260 : vector<2x1xf32>
      %262 = arith.subf %212, %261 : vector<2x1xf32>
      %263 = math.exp %262 : vector<2x1xf32>
      %264 = arith.subf %260, %261 : vector<2x1xf32>
      %265 = math.exp %264 : vector<2x1xf32>
      %cst_70 = arith.constant 0.000000e+00 : f32
      %266 = vector.broadcast %cst_70 : f32 to vector<2x1xf32>
      %267 = arith.select %258, %265, %266 : vector<2x1xi1>, vector<2x1xf32>
      %268 = arith.mulf %263, %220 : vector<2x1xf32>
      %269 = arith.addf %268, %267 : vector<2x1xf32>
      %270 = vector.broadcast %263 : vector<2x1xf32> to vector<2x32xf32>
      %271 = arith.mulf %270, %225 : vector<2x32xf32>
      %272 = vector.broadcast %267 : vector<2x1xf32> to vector<2x32xf32>
      %273 = arith.mulf %272, %251 : vector<2x32xf32>
      %274 = arith.addf %271, %273 : vector<2x32xf32>
      %c5_i32 = arith.constant 5 : i32
      %cst_71 = arith.constant dense<0.000000e+00> : vector<2x96xf32>
      %275 = tpu.matmul %251, %21, %cst_71 {dimension_numbers = #tpu.dot_dimension_numbers<[1], [0], [0], [1], [0, 0, 1, 1], [], []>} : vector<2x32xf32>, vector<32x96xf32>, vector<2x96xf32> -> vector<2x96xf32>
      %276 = arith.index_cast %c5_i32 : i32 to index
      %c0_72 = arith.constant 0 : index
      %c0_73 = arith.constant 0 : index
      %277 = vector.load %arg11[%276, %c0_72, %c0_73] : memref<8x2x96xf32, #tpu.memory_space<vmem>>, vector<1x2x96xf32>
      %278 = vector.shape_cast %277 : vector<1x2x96xf32> to vector<2x96xf32>
      %279 = vector.extract_strided_slice %278 {offsets = [0, 0], sizes = [2, 64], strides = [1, 1]} : vector<2x96xf32> to vector<2x64xf32>
      %280 = vector.extract_strided_slice %275 {offsets = [0, 0], sizes = [2, 64], strides = [1, 1]} : vector<2x96xf32> to vector<2x64xf32>
      %281 = arith.addf %279, %280 : vector<2x64xf32>
      %282 = arith.negf %281 : vector<2x64xf32>
      %283 = math.exp %282 : vector<2x64xf32>
      %cst_74 = arith.constant 1.000000e+00 : f32
      %284 = vector.broadcast %cst_74 : f32 to vector<2x64xf32>
      %285 = arith.addf %284, %283 : vector<2x64xf32>
      %286 = arith.divf %284, %285 : vector<2x64xf32>
      %287 = vector.extract_strided_slice %286 {offsets = [0, 0], sizes = [2, 32], strides = [1, 1]} : vector<2x64xf32> to vector<2x32xf32>
      %288 = vector.extract_strided_slice %286 {offsets = [0, 32], sizes = [2, 32], strides = [1, 1]} : vector<2x64xf32> to vector<2x32xf32>
      %289 = vector.extract_strided_slice %278 {offsets = [0, 64], sizes = [2, 32], strides = [1, 1]} : vector<2x96xf32> to vector<2x32xf32>
      %290 = vector.extract_strided_slice %275 {offsets = [0, 64], sizes = [2, 32], strides = [1, 1]} : vector<2x96xf32> to vector<2x32xf32>
      %291 = vector.broadcast %22 : vector<1x32xf32> to vector<2x32xf32>
      %292 = arith.addf %290, %291 : vector<2x32xf32>
      %293 = arith.mulf %287, %292 : vector<2x32xf32>
      %294 = arith.addf %289, %293 : vector<2x32xf32>
      %295 = math.tanh %294 : vector<2x32xf32>
      %cst_75 = arith.constant 1.000000e+00 : f32
      %296 = vector.broadcast %cst_75 : f32 to vector<2x32xf32>
      %297 = arith.subf %296, %288 : vector<2x32xf32>
      %298 = arith.mulf %297, %295 : vector<2x32xf32>
      %299 = arith.mulf %288, %251 : vector<2x32xf32>
      %300 = arith.addf %298, %299 : vector<2x32xf32>
      %301 = vector.broadcast %23 : vector<1x32xf32> to vector<2x32xf32>
      %302 = arith.mulf %300, %301 : vector<2x32xf32>
      %cst_76 = arith.constant dense<0.000000e+00> : vector<2xf32>
      %303 = vector.multi_reduction <add>, %302, %cst_76 [1] : vector<2x32xf32> to vector<2xf32>
      %304 = vector.shape_cast %303 : vector<2xf32> to vector<2x1xf32>
      %305 = arith.addi %25, %c5_i32 : i32
      %306 = vector.broadcast %305 : i32 to vector<2x1xi32>
      %307 = arith.cmpi slt, %306, %24 : vector<2x1xi32>
      %cst_77 = arith.constant -1.000000e+30 : f32
      %308 = vector.broadcast %cst_77 : f32 to vector<2x1xf32>
      %309 = arith.select %307, %304, %308 : vector<2x1xi1>, vector<2x1xf32>
      %310 = arith.maximumf %261, %309 : vector<2x1xf32>
      %311 = arith.subf %261, %310 : vector<2x1xf32>
      %312 = math.exp %311 : vector<2x1xf32>
      %313 = arith.subf %309, %310 : vector<2x1xf32>
      %314 = math.exp %313 : vector<2x1xf32>
      %cst_78 = arith.constant 0.000000e+00 : f32
      %315 = vector.broadcast %cst_78 : f32 to vector<2x1xf32>
      %316 = arith.select %307, %314, %315 : vector<2x1xi1>, vector<2x1xf32>
      %317 = arith.mulf %312, %269 : vector<2x1xf32>
      %318 = arith.addf %317, %316 : vector<2x1xf32>
      %319 = vector.broadcast %312 : vector<2x1xf32> to vector<2x32xf32>
      %320 = arith.mulf %319, %274 : vector<2x32xf32>
      %321 = vector.broadcast %316 : vector<2x1xf32> to vector<2x32xf32>
      %322 = arith.mulf %321, %300 : vector<2x32xf32>
      %323 = arith.addf %320, %322 : vector<2x32xf32>
      %c6_i32 = arith.constant 6 : i32
      %cst_79 = arith.constant dense<0.000000e+00> : vector<2x96xf32>
      %324 = tpu.matmul %300, %21, %cst_79 {dimension_numbers = #tpu.dot_dimension_numbers<[1], [0], [0], [1], [0, 0, 1, 1], [], []>} : vector<2x32xf32>, vector<32x96xf32>, vector<2x96xf32> -> vector<2x96xf32>
      %325 = arith.index_cast %c6_i32 : i32 to index
      %c0_80 = arith.constant 0 : index
      %c0_81 = arith.constant 0 : index
      %326 = vector.load %arg11[%325, %c0_80, %c0_81] : memref<8x2x96xf32, #tpu.memory_space<vmem>>, vector<1x2x96xf32>
      %327 = vector.shape_cast %326 : vector<1x2x96xf32> to vector<2x96xf32>
      %328 = vector.extract_strided_slice %327 {offsets = [0, 0], sizes = [2, 64], strides = [1, 1]} : vector<2x96xf32> to vector<2x64xf32>
      %329 = vector.extract_strided_slice %324 {offsets = [0, 0], sizes = [2, 64], strides = [1, 1]} : vector<2x96xf32> to vector<2x64xf32>
      %330 = arith.addf %328, %329 : vector<2x64xf32>
      %331 = arith.negf %330 : vector<2x64xf32>
      %332 = math.exp %331 : vector<2x64xf32>
      %cst_82 = arith.constant 1.000000e+00 : f32
      %333 = vector.broadcast %cst_82 : f32 to vector<2x64xf32>
      %334 = arith.addf %333, %332 : vector<2x64xf32>
      %335 = arith.divf %333, %334 : vector<2x64xf32>
      %336 = vector.extract_strided_slice %335 {offsets = [0, 0], sizes = [2, 32], strides = [1, 1]} : vector<2x64xf32> to vector<2x32xf32>
      %337 = vector.extract_strided_slice %335 {offsets = [0, 32], sizes = [2, 32], strides = [1, 1]} : vector<2x64xf32> to vector<2x32xf32>
      %338 = vector.extract_strided_slice %327 {offsets = [0, 64], sizes = [2, 32], strides = [1, 1]} : vector<2x96xf32> to vector<2x32xf32>
      %339 = vector.extract_strided_slice %324 {offsets = [0, 64], sizes = [2, 32], strides = [1, 1]} : vector<2x96xf32> to vector<2x32xf32>
      %340 = vector.broadcast %22 : vector<1x32xf32> to vector<2x32xf32>
      %341 = arith.addf %339, %340 : vector<2x32xf32>
      %342 = arith.mulf %336, %341 : vector<2x32xf32>
      %343 = arith.addf %338, %342 : vector<2x32xf32>
      %344 = math.tanh %343 : vector<2x32xf32>
      %cst_83 = arith.constant 1.000000e+00 : f32
      %345 = vector.broadcast %cst_83 : f32 to vector<2x32xf32>
      %346 = arith.subf %345, %337 : vector<2x32xf32>
      %347 = arith.mulf %346, %344 : vector<2x32xf32>
      %348 = arith.mulf %337, %300 : vector<2x32xf32>
      %349 = arith.addf %347, %348 : vector<2x32xf32>
      %350 = vector.broadcast %23 : vector<1x32xf32> to vector<2x32xf32>
      %351 = arith.mulf %349, %350 : vector<2x32xf32>
      %cst_84 = arith.constant dense<0.000000e+00> : vector<2xf32>
      %352 = vector.multi_reduction <add>, %351, %cst_84 [1] : vector<2x32xf32> to vector<2xf32>
      %353 = vector.shape_cast %352 : vector<2xf32> to vector<2x1xf32>
      %354 = arith.addi %25, %c6_i32 : i32
      %355 = vector.broadcast %354 : i32 to vector<2x1xi32>
      %356 = arith.cmpi slt, %355, %24 : vector<2x1xi32>
      %cst_85 = arith.constant -1.000000e+30 : f32
      %357 = vector.broadcast %cst_85 : f32 to vector<2x1xf32>
      %358 = arith.select %356, %353, %357 : vector<2x1xi1>, vector<2x1xf32>
      %359 = arith.maximumf %310, %358 : vector<2x1xf32>
      %360 = arith.subf %310, %359 : vector<2x1xf32>
      %361 = math.exp %360 : vector<2x1xf32>
      %362 = arith.subf %358, %359 : vector<2x1xf32>
      %363 = math.exp %362 : vector<2x1xf32>
      %cst_86 = arith.constant 0.000000e+00 : f32
      %364 = vector.broadcast %cst_86 : f32 to vector<2x1xf32>
      %365 = arith.select %356, %363, %364 : vector<2x1xi1>, vector<2x1xf32>
      %366 = arith.mulf %361, %318 : vector<2x1xf32>
      %367 = arith.addf %366, %365 : vector<2x1xf32>
      %368 = vector.broadcast %361 : vector<2x1xf32> to vector<2x32xf32>
      %369 = arith.mulf %368, %323 : vector<2x32xf32>
      %370 = vector.broadcast %365 : vector<2x1xf32> to vector<2x32xf32>
      %371 = arith.mulf %370, %349 : vector<2x32xf32>
      %372 = arith.addf %369, %371 : vector<2x32xf32>
      %c7_i32 = arith.constant 7 : i32
      %cst_87 = arith.constant dense<0.000000e+00> : vector<2x96xf32>
      %373 = tpu.matmul %349, %21, %cst_87 {dimension_numbers = #tpu.dot_dimension_numbers<[1], [0], [0], [1], [0, 0, 1, 1], [], []>} : vector<2x32xf32>, vector<32x96xf32>, vector<2x96xf32> -> vector<2x96xf32>
      %374 = arith.index_cast %c7_i32 : i32 to index
      %c0_88 = arith.constant 0 : index
      %c0_89 = arith.constant 0 : index
      %375 = vector.load %arg11[%374, %c0_88, %c0_89] : memref<8x2x96xf32, #tpu.memory_space<vmem>>, vector<1x2x96xf32>
      %376 = vector.shape_cast %375 : vector<1x2x96xf32> to vector<2x96xf32>
      %377 = vector.extract_strided_slice %376 {offsets = [0, 0], sizes = [2, 64], strides = [1, 1]} : vector<2x96xf32> to vector<2x64xf32>
      %378 = vector.extract_strided_slice %373 {offsets = [0, 0], sizes = [2, 64], strides = [1, 1]} : vector<2x96xf32> to vector<2x64xf32>
      %379 = arith.addf %377, %378 : vector<2x64xf32>
      %380 = arith.negf %379 : vector<2x64xf32>
      %381 = math.exp %380 : vector<2x64xf32>
      %cst_90 = arith.constant 1.000000e+00 : f32
      %382 = vector.broadcast %cst_90 : f32 to vector<2x64xf32>
      %383 = arith.addf %382, %381 : vector<2x64xf32>
      %384 = arith.divf %382, %383 : vector<2x64xf32>
      %385 = vector.extract_strided_slice %384 {offsets = [0, 0], sizes = [2, 32], strides = [1, 1]} : vector<2x64xf32> to vector<2x32xf32>
      %386 = vector.extract_strided_slice %384 {offsets = [0, 32], sizes = [2, 32], strides = [1, 1]} : vector<2x64xf32> to vector<2x32xf32>
      %387 = vector.extract_strided_slice %376 {offsets = [0, 64], sizes = [2, 32], strides = [1, 1]} : vector<2x96xf32> to vector<2x32xf32>
      %388 = vector.extract_strided_slice %373 {offsets = [0, 64], sizes = [2, 32], strides = [1, 1]} : vector<2x96xf32> to vector<2x32xf32>
      %389 = vector.broadcast %22 : vector<1x32xf32> to vector<2x32xf32>
      %390 = arith.addf %388, %389 : vector<2x32xf32>
      %391 = arith.mulf %385, %390 : vector<2x32xf32>
      %392 = arith.addf %387, %391 : vector<2x32xf32>
      %393 = math.tanh %392 : vector<2x32xf32>
      %cst_91 = arith.constant 1.000000e+00 : f32
      %394 = vector.broadcast %cst_91 : f32 to vector<2x32xf32>
      %395 = arith.subf %394, %386 : vector<2x32xf32>
      %396 = arith.mulf %395, %393 : vector<2x32xf32>
      %397 = arith.mulf %386, %349 : vector<2x32xf32>
      %398 = arith.addf %396, %397 : vector<2x32xf32>
      %399 = vector.broadcast %23 : vector<1x32xf32> to vector<2x32xf32>
      %400 = arith.mulf %398, %399 : vector<2x32xf32>
      %cst_92 = arith.constant dense<0.000000e+00> : vector<2xf32>
      %401 = vector.multi_reduction <add>, %400, %cst_92 [1] : vector<2x32xf32> to vector<2xf32>
      %402 = vector.shape_cast %401 : vector<2xf32> to vector<2x1xf32>
      %403 = arith.addi %25, %c7_i32 : i32
      %404 = vector.broadcast %403 : i32 to vector<2x1xi32>
      %405 = arith.cmpi slt, %404, %24 : vector<2x1xi32>
      %cst_93 = arith.constant -1.000000e+30 : f32
      %406 = vector.broadcast %cst_93 : f32 to vector<2x1xf32>
      %407 = arith.select %405, %402, %406 : vector<2x1xi1>, vector<2x1xf32>
      %408 = arith.maximumf %359, %407 : vector<2x1xf32>
      %409 = arith.subf %359, %408 : vector<2x1xf32>
      %410 = math.exp %409 : vector<2x1xf32>
      %411 = arith.subf %407, %408 : vector<2x1xf32>
      %412 = math.exp %411 : vector<2x1xf32>
      %cst_94 = arith.constant 0.000000e+00 : f32
      %413 = vector.broadcast %cst_94 : f32 to vector<2x1xf32>
      %414 = arith.select %405, %412, %413 : vector<2x1xi1>, vector<2x1xf32>
      %415 = arith.mulf %410, %367 : vector<2x1xf32>
      %416 = arith.addf %415, %414 : vector<2x1xf32>
      %417 = vector.broadcast %410 : vector<2x1xf32> to vector<2x32xf32>
      %418 = arith.mulf %417, %372 : vector<2x32xf32>
      %419 = vector.broadcast %414 : vector<2x1xf32> to vector<2x32xf32>
      %420 = arith.mulf %419, %398 : vector<2x32xf32>
      %421 = arith.addf %418, %420 : vector<2x32xf32>
      %c8_i32_95 = arith.constant 8 : i32
      %c0_96 = arith.constant 0 : index
      %c0_97 = arith.constant 0 : index
      %422 = vector.load %arg12[%c0_96, %c0_97] : memref<2x32xf32, #tpu.memory_space<vmem>>, vector<2x32xf32>
      tpu.vector_store %arg12[%c0_96, %c0_97], %398 {strides = array<i32>} : memref<2x32xf32, #tpu.memory_space<vmem>>, vector<2x32xf32>,
      %c0_98 = arith.constant 0 : index
      %c0_99 = arith.constant 0 : index
      %423 = vector.load %arg13[%c0_98, %c0_99] : memref<2x1xf32, #tpu.memory_space<vmem>>, vector<2x1xf32>
      tpu.vector_store %arg13[%c0_98, %c0_99], %408 {strides = array<i32>} : memref<2x1xf32, #tpu.memory_space<vmem>>, vector<2x1xf32>,
      %c0_100 = arith.constant 0 : index
      %c0_101 = arith.constant 0 : index
      %424 = vector.load %arg14[%c0_100, %c0_101] : memref<2x1xf32, #tpu.memory_space<vmem>>, vector<2x1xf32>
      tpu.vector_store %arg14[%c0_100, %c0_101], %416 {strides = array<i32>} : memref<2x1xf32, #tpu.memory_space<vmem>>, vector<2x1xf32>,
      %c0_102 = arith.constant 0 : index
      %c0_103 = arith.constant 0 : index
      %425 = vector.load %arg15[%c0_102, %c0_103] : memref<2x32xf32, #tpu.memory_space<vmem>>, vector<2x32xf32>
      tpu.vector_store %arg15[%c0_102, %c0_103], %421 {strides = array<i32>} : memref<2x32xf32, #tpu.memory_space<vmem>>, vector<2x32xf32>,
    } else {
    }
    %c1_i32 = arith.constant 1 : i32
    %9 = arith.cmpi eq, %arg1, %c1_i32 : i32
    %10 = arith.extui %9 : i1 to i32
    %c0_i32_2 = arith.constant 0 : i32
    %11 = arith.cmpi ne, %10, %c0_i32_2 : i32
    scf.if %11 {
      %c0 = arith.constant 0 : index
      %c0_3 = arith.constant 0 : index
      %12 = vector.load %arg14[%c0, %c0_3] : memref<2x1xf32, #tpu.memory_space<vmem>>, vector<2x1xf32>
      %cst = arith.constant 1.000000e-30 : f32
      %13 = vector.broadcast %cst : f32 to vector<2x1xf32>
      %14 = arith.maximumf %12, %13 : vector<2x1xf32>
      %c0_4 = arith.constant 0 : index
      %c0_5 = arith.constant 0 : index
      %15 = vector.load %arg15[%c0_4, %c0_5] : memref<2x32xf32, #tpu.memory_space<vmem>>, vector<2x32xf32>
      %16 = tpu.reciprocal %14 : vector<2x1xf32> -> vector<2x1xf32>
      %17 = vector.broadcast %16 : vector<2x1xf32> to vector<2x32xf32>
      %18 = arith.mulf %15, %17 : vector<2x32xf32>
      %c0_6 = arith.constant 0 : index
      %c0_7 = arith.constant 0 : index
      %19 = vector.load %arg10[%c0_6, %c0_7] : memref<2x32xf32, #tpu.memory_space<vmem>>, vector<2x32xf32>
      tpu.vector_store %arg10[%c0_6, %c0_7], %18 {strides = array<i32>} : memref<2x32xf32, #tpu.memory_space<vmem>>, vector<2x32xf32>,
    } else {
    }
    return
  }
  func.func @transform_0(%arg0: i32, %arg1: i32, %arg2: memref<1xi32, #tpu.memory_space<smem>>) -> (i32, i32, i32) {
    %c0_i32 = arith.constant 0 : i32
    %c0_i32_0 = arith.constant 0 : i32
    return %arg1, %arg0, %c0_i32 : i32, i32, i32
  }
  func.func @transform_1(%arg0: i32, %arg1: i32, %arg2: memref<1xi32, #tpu.memory_space<smem>>) -> (i32, i32) {
    %c0_i32 = arith.constant 0 : i32
    %c0_i32_0 = arith.constant 0 : i32
    return %arg0, %c0_i32 : i32, i32
  }
  func.func @transform_2(%arg0: i32, %arg1: i32, %arg2: memref<1xi32, #tpu.memory_space<smem>>) -> (i32, i32) {
    %c0_i32 = arith.constant 0 : i32
    %c0_i32_0 = arith.constant 0 : i32
    %c0_i32_1 = arith.constant 0 : i32
    return %c0_i32, %c0_i32_0 : i32, i32
  }
  func.func @transform_3(%arg0: i32, %arg1: i32, %arg2: memref<1xi32, #tpu.memory_space<smem>>) -> (i32, i32) {
    %c0_i32 = arith.constant 0 : i32
    %c0_i32_0 = arith.constant 0 : i32
    %c0_i32_1 = arith.constant 0 : i32
    return %c0_i32, %c0_i32_0 : i32, i32
  }
  func.func @transform_4(%arg0: i32, %arg1: i32, %arg2: memref<1xi32, #tpu.memory_space<smem>>) -> (i32, i32) {
    %c0_i32 = arith.constant 0 : i32
    %c0_i32_0 = arith.constant 0 : i32
    %c0_i32_1 = arith.constant 0 : i32
    return %c0_i32, %c0_i32_0 : i32, i32
  }
  func.func @transform_5(%arg0: i32, %arg1: i32, %arg2: memref<1xi32, #tpu.memory_space<smem>>) -> (i32, i32) {
    %c0_i32 = arith.constant 0 : i32
    %c0_i32_0 = arith.constant 0 : i32
    %c0_i32_1 = arith.constant 0 : i32
    return %c0_i32, %c0_i32_0 : i32, i32
  }
  func.func @transform_6(%arg0: i32, %arg1: i32, %arg2: memref<1xi32, #tpu.memory_space<smem>>) -> (i32, i32) {
    %c0_i32 = arith.constant 0 : i32
    %c0_i32_0 = arith.constant 0 : i32
    %c0_i32_1 = arith.constant 0 : i32
    return %c0_i32, %c0_i32_0 : i32, i32
  }
  func.func @transform_7(%arg0: i32, %arg1: i32, %arg2: memref<1xi32, #tpu.memory_space<smem>>) -> (i32, i32) {
    %c0_i32 = arith.constant 0 : i32
    %c0_i32_0 = arith.constant 0 : i32
    return %arg0, %c0_i32 : i32, i32
  }
}

</mosaic_0001>

<bundles_post_ra>
// kernel: tpu_custom_call.1
= control target key start
LH: loop header
LB: loop body
LE: loop exit
PB: predicated region body
PF: predicated region fallthrough
CT: control target
= control target key end

     0   :  { %s2317_s0 = inlined_call_operand.<no memory space> [shape: s32[1], index: 0, kind: input, shape index: {}]   ;;  %s2318_s1 = inlined_call_operand.hbm [shape: f32[16,2,16], index: 1, kind: input, shape index: {}]   ;;  %s2319_s2 = inlined_call_operand.vmem [shape: s32[2,1], index: 2, kind: input, shape index: {}]   ;;  %s2320_s3 = inlined_call_operand.hbm [shape: f32[16,96], index: 3, kind: input, shape index: {}]   ;;  %s2321_s4 = inlined_call_operand.vmem [shape: f32[1,96], index: 4, kind: input, shape index: {}]   ;;  %s2322_s5 = inlined_call_operand.hbm [shape: f32[32,96], index: 5, kind: input, shape index: {}]   ;;  %s2323_s6 = inlined_call_operand.vmem [shape: f32[1,32], index: 6, kind: input, shape index: {}]   ;;  %s2324_s7 = inlined_call_operand.vmem [shape: f32[1,32], index: 7, kind: input, shape index: {}]   ;;  %s2325_s8 = inlined_call_operand.hbm [shape: f32[2,32], index: 8, kind: output, shape index: {}]  }
   0x1   :  { %2327 = sst [smem:[#allocation19_spill]] %s2320_s3 }
   0x2   :  { %2328 = sst [smem:[#allocation20_spill]] %s2322_s5 }
   0x3   :  { %13 = sst [smem:[#allocation8]] %s2317_s0 }
   0x4   :  { %14 = vsyncpa [#allocation10], 0 }
   0x5   :  { %16 = vsyncpa [#allocation10 + $0x1], 0 }
   0x6   :  { %17 = vsyncpa [#allocation13], 0 }
   0x7   :  { %18 = vsyncpa [#allocation11], 0  ;;  %s1945_s29 = smov 0   ;;  %s1947_s30 = smov 0  }
   0x8   :  { %s1949_s9 = smov 0   ;;  %s1951_s10 = smov 0  }
   0x9   :  { %s1953_s11 = smov 0   ;;  %s1955_s12 = smov 0  }
   0xa LB: > { %s2326_s0 = sadd.s32 4294967295, %s1881_s12   ;;  %p58_p0 = scmp.ne.s32.totalorder %s1865_s30, %s1861_s29  ;;  %s1881_s12 = sphi %s1955_s12, %s24_s12   ;;  %s1877_s11 = sphi %s1953_s11, %s2342_s11   ;;  %s1873_s10 = sphi %s1951_s10, %s2341_s10   ;;  %s1869_s9 = sphi %s1949_s9, %s2340_s9   ;;  %s1865_s30 = sphi %s1947_s30, %s2339_s30   ;;  %s1861_s29 = sphi %s1945_s29, %s2338_s29  }
   0xb   : > { %p1977_p1 = scmp.eq.s32.totalorder %s2326_s0, 0  ;;  %p1483_p2 = scmp.ge.s32.totalorder %s1881_s12, 1 }
   0xc   : > { %p226_p3 = scmp.lt.s32.totalorder %s1881_s12, 3  ;;  %s2331_s3 = sld [smem:[#allocation19_spill]] }
   0xd   : > { %p1985_p4 = por %p1977_p1, %p58_p0  ;;  %s1883_s19 = smov [#allocation12]  }
   0xe   : > { %p1992_p5 = pnand %p1483_p2, %p226_p3  ;;  %s246_s20 = sshll.u32 %s1883_s19, 4  ;;  %s247_s20 = int_to_ptr.vmem [resolvable:$true] %s246_s20 }
   0xf   : > { %s2333_s5 = sld [smem:[#allocation20_spill]]  ;;  %s1884_s24 = smov 128  }
  0x10   : > { %p1536_p6 = pneg %p1992_p5  ;;  %s1885_s25 = smov 8  }
  0x11   : > { %s1886_s26 = smov [#allocation14]   ;;  %s33_s28 = sadd.s32 1, %s1877_s11 }
  0x12   : > { %s244_s17 = sshll.u32 %s2331_s3, 4  ;;  %p1537_p7 = pnand %p1536_p6, %p1977_p1  ;;  %s245_s17 = int_to_ptr.hbm [resolvable:$true] %s244_s17 }
  0x13   : > { %s263_s27 = sshll.u32 %s1886_s26, 4  ;;  %s45_s29 = sadd.s32 1, %s1869_s9  ;;  %s264_s27 = int_to_ptr.vmem [resolvable:$true] %s263_s27 }
  0x14   : > { %1539 = dma.hbm_to_vmem [thread:$0]  (!%p1537_p7), %s245_s17, 256, %s247_s20, [#allocation13], %s1884_s24, %s1884_s24, %s1885_s25  }
  0x15   : > { %s261_s23 = sshll.u32 %s2333_s5, 4  ;;  %p34_p8 = scmp.ge.s32.totalorder %s33_s28, 2  ;;  %s262_s23 = int_to_ptr.hbm [resolvable:$true] %s261_s23 }
  0x16   : > { %1542 = dma.hbm_to_vmem [thread:$0]  (!%p1537_p7), %s262_s23, 512, %s264_s27, [#allocation13], %s1884_s24, %s1884_s24, %s1885_s25  }
  0x17   : > { %p52_p9 = scmp.ne.s32.totalorder %s1869_s9, %s1865_s30  ;;  %p53_p10 = scmp.eq.s32.totalorder %s1881_s12, 0 }
  0x18   : > { %p1549_p11 = scmp.lt.s32.totalorder %s1881_s12, 2  ;;  %s2344_s28 = smov (%p34_p8, %s33_s28), 0 }
  0x19   : > { %p2011_p12 = por %p53_p10, %p52_p9  ;;  %s283_s16 = sand.u32 1, %s1869_s9  }
  0x1a   : > { %s40_s17 = ssub.s32 %s1877_s11, %s2344_s28  ;;  %s1488_s19 = sshll.u32 %s283_s16, 4 }
  0x1b   : > { %p43_p13 = scmp.eq.s32.totalorder %s40_s17, 0  ;;  %s1521_s20 = sshll.u32 %s1877_s11, 4 }
  0x1c   : > { %s293_s24 = scalar_lea.hbm %s2318_s1, %s1521_s20  ;;  %s287_s25 = scalar_lea.vmem [#allocation9], %s1488_s19 }
  0x1d   : > { %s2020_s21 = scalar_select %p43_p13, %s1869_s9, %s45_s29  }
  0x1e   : > { %s296_s26 = sshll.u32 %s287_s25, 4  ;;  %s294_s27 = sshll.u32 %s293_s24, 4  ;;  %s297_s26 = int_to_ptr.vmem [resolvable:$true] %s296_s26  ;;  %s295_s27 = int_to_ptr.hbm [resolvable:$true] %s294_s27 }
  0x1f   : > { %p1544_p0 = pnand %p1549_p11, %p2011_p12  ;;  %s284_s0 = scalar_lea.sflag [#allocation10], %s283_s16 }
  0x20   : > { %s1887_s3 = smov 32   ;;  %s1888_s5 = smov 2  }
  0x21   : > { %1546 = dma.hbm_to_vmem [thread:$0]  (!%p1544_p0), %s295_s27, 256, %s297_s26, %s284_s0, %s1887_s3, %s1887_s3, %s1888_s5  }
  0x22   : > { %308 = sbr.rel (%p1992_p5) target bundleno = 5974 (0x1756), region = 48  ;;  %s310_s29 = sand.u32 (!%p1992_p5), 1, %s1865_s30  }
  0x23   : > { %s1492_s17 = sshll.u32 (!%p1992_p5), %s310_s29, 4  ;;  %s311_s20 = scalar_lea.sflag (!%p1992_p5), [#allocation10], %s310_s29 }
  0x24   : > { %s2032_s19 = scalar_lea.vmem (!%p1992_p5), [#allocation9], %s1492_s17 }
  0x27   : > { %1848 = dma.done.wait (%p1985_p4), %s311_s20, 256  }
  0x28   : > { %1850 = vsyncadd (%p1985_p4), %s311_s20, 4294967040 }
  0x29   : > { %1852 = dma.done.wait (%p1977_p1), [#allocation13], 768  }
  0x2a   : > { %1854 = vsyncadd (%p1977_p1), [#allocation13], 4294966528  ;;  %p1495_p2 = scmp.ne.s32.totalorder %s1873_s10, 0 }
  0x2c   : > { %363 = sbr.rel (%p1495_p2) target bundleno = 54 (0x36), region = 64 }
  0x31   : > { %vm364_vm0 = vcmask 254976   ;;  %vm366_vm1 = vcmask 1024   ;;  %v1889_v0 = vmov 0.0   ;;  %v1890_v1 = vmov -1e+30  }
  0x32   : > { %365 = vst.msk [vmem:[#allocation3] sm:$0x3] %vm364_vm0, %v1889_v0 }
  0x33   : > { %369 = vst.msk [vmem:[#allocation6] sm:$0x3] %vm364_vm0, %v1889_v0 }
  0x34   : > { %367 = vst.msk [vmem:[#allocation4] sm:$0x3] %vm366_vm1, %v1890_v1 }
  0x35   : > { %368 = vst.msk [vmem:[#allocation5] sm:$0x3] %vm366_vm1, %v1889_v0 }
  0x36 PF: > { %s2044_s3 = sshll.u32 %s1873_s10, 3  ;;  %s371_s5 = sld [smem:[#allocation8]] }
  0x3c   : > { %p1497_p3 = scmp.ge.s32.totalorder %s2044_s3, %s371_s5 }
  0x3d   : > { %s1891_s0 = smov (!%p1497_p3), 32   ;;  %s1892_s18 = smov (!%p1497_p3), 64  }
  0x3e   : > { %375 = sbr.rel (%p1497_p3) target bundleno = 5823 (0x16bf), region = 68  ;;  %s1893_s22 = smov (!%p1497_p3), 96  }
  0x3f   : > { %s669_s27 = sadd.s32 (!%p1497_p3), 1, %s2044_s3  ;;  %s775_s29 = sadd.s32 (!%p1497_p3), 2, %s2044_s3 }
  0x40   : > { %s881_s17 = sadd.s32 (!%p1497_p3), 3, %s2044_s3  ;;  %s987_s20 = sadd.s32 (!%p1497_p3), 4, %s2044_s3 }
  0x41   : > { %s1199_s5 = sadd.s32 (!%p1497_p3), 6, %s2044_s3 }
  0x43   : > { %v469_v2 = vld [vmem:[#allocation14 + $0x18] sm:$0xff]  ;;  %v468_v3 = vld [vmem:[#allocation14 + $0x10] sm:$0xff]  ;;  %v467_v4 = vld [vmem:[#allocation14 + $0x8] sm:$0xff]  ;;  %vm477_vm2 = vcmask 261120   ;;  %vm415_vm3 = vcmask 130048   ;;  %vm457_vm4 = vcmask 779264  }
  0x44   : > { %493 = vmatpush.msra.mxu1 %v469_v2  ;;  %v377_v5 = vld [vmem:[#allocation12 + $0x8] sm:$0xff]  ;;  %v376_v6 = vld [vmem:[#allocation12] sm:$0xff]  ;;  %611 = vmatpush.msra.mxu2 %v469_v2  ;;  %v466_v7 = vld [vmem:[#allocation14] sm:$0xff] }
  0x45   : > { %434 = vmatpush.msra.mxu0 %v377_v5  ;;  %v473_v8 = vld [vmem:[#allocation3] sm:$0x3]  ;;  %v378_v9 = vld [vmem:[%s2032_s19] sm:$0x3]  ;;  %v379_v10 = vld [vmem:[%s2032_s19 + $0x2] sm:$0x3]  ;;  %717 = vmatpush.msra.mxu3 %v469_v2 }
  0x46   : > { %494 = vmatpush.msra.mxu1 %v468_v3  ;;  %v380_v11 = vld [vmem:[%s2032_s19 + $0x4] sm:$0x3]  ;;  %v381_v12 = vld [vmem:[%s2032_s19 + $0x6] sm:$0x3]  ;;  %398 = vst [vmem:[#allocation1] ss:$4 sm:$0xff] %v378_v9  ;;  %545 = vrot.lane.b32.xlu2 %v473_v8, %s1891_s0 }
  0x47   : > { %435 = vmatpush.msra.mxu0 %v376_v6  ;;  %400 = vst [vmem:[#allocation1 + $0x1] ss:$4 sm:$0xff] %v379_v10  ;;  %v1619_v13 = vld [vmem:[%s2323_s6] ss:$0 sm:$0xff]  ;;  %612 = vmatpush.msra.mxu2 %v468_v3 }
  0x48   : > { %495 = vmatpush.msra.mxu1 %v467_v4  ;;  %402 = vst [vmem:[#allocation1 + $0x2] ss:$4 sm:$0xff] %v380_v11  ;;  %718 = vmatpush.msra.mxu3 %v468_v3  ;;  %v2064_v18 = vld [vmem:[%s2321_s4] ss:$0 sm:$0xff] }
  0x49   : > { %404 = vst [vmem:[#allocation1 + $0x3] ss:$4 sm:$0xff] %v381_v12  ;;  %524 = vrot.lane.b32.xlu0 %v1619_v13, %s1892_s18  ;;  %613 = vmatpush.msra.mxu2 %v467_v4 }
  0x4a   : > { %496 = vmatpush.msra.mxu1 %v466_v7  ;;  %719 = vmatpush.msra.mxu3 %v467_v4 }
  0x4b   : > { %1500 = vmatmul.msk.f32.vlgmr.msra.gmra.mxu1 %vm477_vm2, %v473_v8  ;;  %614 = vmatpush.msra.mxu2 %v466_v7 }
  0x4c   : > { %720 = vmatpush.msra.mxu3 %v466_v7  ;;  %823 = vmatpush.msrb.mxu1 %v469_v2 }
  0x4d   : > { %929 = vmatpush.msrb.mxu2 %v469_v2  ;;  %1141 = vmatpush.msrb.mxu0 %v469_v2 }
  0x4e   : > { %1035 = vmatpush.msrb.mxu3 %v469_v2  ;;  %824 = vmatpush.msrb.mxu1 %v468_v3 }
  0x4f   : > { %930 = vmatpush.msrb.mxu2 %v468_v3  ;;  %1142 = vmatpush.msrb.mxu0 %v468_v3 }
  0x50   : > { %1036 = vmatpush.msrb.mxu3 %v468_v3  ;;  %v413_v14 = vld.sshfl [vmem:[#allocation1] sm:$0xff pattern:$0x73625140]  ;;  %825 = vmatpush.msrb.mxu1 %v467_v4 }
  0x51   : > { %1498 = vmatmul.msk.f32.vlgmr.msra.gmra.mxu0 %vm415_vm3, %v413_v14  ;;  %931 = vmatpush.msrb.mxu2 %v467_v4 }
  0x52   : > { %826 = vmatpush.msrb.mxu1 %v466_v7  ;;  %1037 = vmatpush.msrb.mxu3 %v467_v4 }
  0x53   : > { %932 = vmatpush.msrb.mxu2 %v466_v7  ;;  %1143 = vmatpush.msrb.mxu0 %v467_v4 }
  0x54   : > { %1038 = vmatpush.msrb.mxu3 %v466_v7  ;;  %1247 = vmatpush.msra.mxu1 %v469_v2 }
  0x55   : > { %1144 = vmatpush.msrb.mxu0 %v466_v7 }
  0x56   : > { %1248 = vmatpush.msra.mxu1 %v468_v3 }
  0x58   : > { %1249 = vmatpush.msra.mxu1 %v467_v4 }
  0x5a   : > { %1250 = vmatpush.msra.mxu1 %v466_v7 }
  0xa0   : > { %v546_v44 = vpop.permute.xlu2 %545 }
  0xbb   : > { %v2058_v15 = vpop.permute.xlu0 %524 }
  0xc8   : > { %v498_v16 = vpop.f32.mrf.mxu1 }
  0xc9   : > { %v527_v17 = vadd.f32 %v2058_v15, %v498_v16 }
  0xcb   : > { %529 = vrot.lane.b32.xlu0 %v527_v17, %s1892_s18 }
  0xce   : > { %v437_v19 = vpop.f32.mrf.mxu0 }
  0xcf   : > { %v438_v20 = vadd.f32 %v2064_v18, %v437_v19 }
  0xd1   : > { %v445_v21 = vrot.slane %v438_v20, 2  ;;  %v446_v22 = vrot.slane %v438_v20, 4  ;;  %v447_v23 = vrot.slane %v438_v20, 6  ;;  %458 = vst.msk [vmem:[#allocation2] sm:$0x3] %vm457_vm4, %v438_v20 }
  0xd3   : > { %459 = vst.msk [vmem:[#allocation2 + $0x2] sm:$0x3] %vm457_vm4, %v445_v21 }
  0xd4   : > { %460 = vst.msk [vmem:[#allocation2 + $0x4] sm:$0x3] %vm457_vm4, %v446_v22 }
  0xd5   : > { %461 = vst.msk [vmem:[#allocation2 + $0x6] sm:$0x3] %vm457_vm4, %v447_v23 }
  0xd8   : > { %v501_v24 = vld [vmem:[#allocation2] sm:$0x3] }
  0xd9   : > { %v502_v25 = vadd.f32 %v501_v24, %v498_v16 }
  0xda   : > { %v620_v53 = vld [vmem:[#allocation2 + $0x2] sm:$0x3] }
  0xdb   : > { %v1501_v26 = vmul.f32 -1.442695, %v502_v25  ;;  %v726_v19 = vld [vmem:[#allocation2 + $0x4] sm:$0x3] }
  0xdd   : > { %1622 = vpow2.f32 %v1501_v26 }
  0xe3   : > { %v1623_v27 = vpop.eup %1622 }
  0xe4   : > { %v506_v28 = vadd.f32 1.0, %v1623_v27 }
  0xe6   : > { %1624 = vrcp.f32 %v506_v28  ;;  %v518_v34 = vand.u32 2147483648, %v506_v28  ;;  %vm512_vm6 = vweird.f32 %v506_v28  ;;  %v516_v35 = vand.u32 2147483647, %v506_v28 }
  0xe8   : > { %v519_v37 = vor.u32 1.1754944e-38, %v518_v34  ;;  %vm517_vm8 = vcmp.eq.f32.partialorder %v516_v35, 8.507059e+37 }
  0xec   : > { %v1625_v29 = vpop.eup %1624 }
  0xed   : > { %v508_v30 = vmul.f32 %v1625_v29, %v506_v28  ;;  %vm513_vm5 = vweird.f32 %v1625_v29 }
  0xee   : > { %vm514_vm7 = vmor %vm512_vm6, %vm513_vm5 }
  0xef   : > { %v509_v31 = vsub.f32 1.0, %v508_v30 }
  0xf1   : > { %v510_v32 = vmul.f32 %v1625_v29, %v509_v31 }
  0xf3   : > { %v511_v33 = vadd.f32 %v1625_v29, %v510_v32 }
  0xf5   : > { %v515_v36 = vsel %vm514_vm7, %v1625_v29, %v511_v33 }
  0xf6   : > { %v520_v38 = vsel %vm517_vm8, %v519_v37, %v515_v36 }
  0xf7   : > { %v539_v45 = vsub.f32 1.0, %v520_v38  ;;  %v548_v47 = vmul.f32 %v546_v44, %v520_v38 }
 0x13d   : > { %v530_v39 = vpop.permute.xlu0 %529 }
 0x13e   : > { %v532_v40 = vmul.f32 %v530_v39, %v520_v38 }
 0x140   : > { %534 = vrot.lane.b32.xlu1 %v532_v40, %s1892_s18 }
 0x1b2   : > { %v535_v41 = vpop.permute.xlu1 %534 }
 0x1b3   : > { %v537_v42 = vadd.f32 %v535_v41, %v501_v24 }
 0x1b5   : > { %1626 = vtanh.f32 %v537_v42 }
 0x1bb   : > { %v1627_v43 = vpop.eup %1626 }
 0x1bc   : > { %541 = vrot.lane.b32.xlu1 %v1627_v43, %s1893_s22 }
 0x22e   : > { %v542_v46 = vpop.permute.xlu1 %541 }
 0x22f   : > { %v544_v48 = vmul.f32 %v542_v46, %v539_v45 }
 0x231   : > { %v2074_v49 = vadd.f32 %v548_v47, %v544_v48  ;;  %v832_v47 = vld [vmem:[#allocation2 + $0x6] sm:$0x3] }
 0x233   : > { %595 = vrot.lane.b32.xlu2 %v2074_v49, %s1893_s22 }
 0x28d   : > { %v596_v50 = vpop.permute.xlu2 %595 }
 0x28e   : > { %1502 = vmatmul.msk.f32.vlgmr.msra.gmra.mxu2 %vm477_vm2, %v596_v50 }
 0x311   : > { %v616_v51 = vpop.f32.mrf.mxu2 }
 0x312   : > { %v641_v52 = vadd.f32 %v616_v51, %v2058_v15  ;;  %v621_v54 = vadd.f32 %v620_v53, %v616_v51 }
 0x314   : > { %643 = vrot.lane.b32.xlu0 %v641_v52, %s1892_s18  ;;  %v1503_v55 = vmul.f32 -1.442695, %v621_v54 }
 0x316   : > { %1628 = vpow2.f32 %v1503_v55 }
 0x31c   : > { %v1629_v56 = vpop.eup %1628 }
 0x31d   : > { %v625_v57 = vadd.f32 1.0, %v1629_v56 }
 0x31f   : > { %1630 = vrcp.f32 %v625_v57  ;;  %v637_v63 = vand.u32 2147483648, %v625_v57  ;;  %vm631_vm10 = vweird.f32 %v625_v57  ;;  %v635_v0 = vand.u32 2147483647, %v625_v57 }
 0x321   : > { %v638_v2 = vor.u32 1.1754944e-38, %v637_v63  ;;  %vm636_vm12 = vcmp.eq.f32.partialorder %v635_v0, 8.507059e+37 }
 0x325   : > { %v1631_v58 = vpop.eup %1630 }
 0x326   : > { %v627_v59 = vmul.f32 %v1631_v58, %v625_v57  ;;  %vm632_vm9 = vweird.f32 %v1631_v58 }
 0x327   : > { %vm633_vm11 = vmor %vm631_vm10, %vm632_vm9 }
 0x328   : > { %v628_v60 = vsub.f32 1.0, %v627_v59 }
 0x32a   : > { %v629_v61 = vmul.f32 %v1631_v58, %v628_v60 }
 0x32c   : > { %v630_v62 = vadd.f32 %v1631_v58, %v629_v61 }
 0x32e   : > { %v634_v1 = vsel %vm633_vm11, %v1631_v58, %v630_v62 }
 0x32f   : > { %v639_v4 = vsel %vm636_vm12, %v638_v2, %v634_v1 }
 0x330   : > { %v653_v9 = vsub.f32 1.0, %v639_v4  ;;  %v659_v11 = vmul.f32 %v639_v4, %v2074_v49 }
 0x386   : > { %v644_v3 = vpop.permute.xlu0 %643 }
 0x387   : > { %v646_v5 = vmul.f32 %v644_v3, %v639_v4  ;;  %v382_v4 = vld [vmem:[%s2032_s19 + $0x8] sm:$0x3] }
 0x388   : > { %406 = vst [vmem:[#allocation1 + $0x20] ss:$4 sm:$0xff] %v382_v4 }
 0x389   : > { %648 = vrot.lane.b32.xlu1 %v646_v5, %s1892_s18  ;;  %v383_v5 = vld [vmem:[%s2032_s19 + $0xa] sm:$0x3] }
 0x38a   : > { %408 = vst [vmem:[#allocation1 + $0x21] ss:$4 sm:$0xff] %v383_v5 }
 0x3fb   : > { %v649_v6 = vpop.permute.xlu1 %648 }
 0x3fc   : > { %v651_v7 = vadd.f32 %v649_v6, %v620_v53  ;;  %v384_v6 = vld [vmem:[%s2032_s19 + $0xc] sm:$0x3] }
 0x3fd   : > { %410 = vst [vmem:[#allocation1 + $0x22] ss:$4 sm:$0xff] %v384_v6 }
 0x3fe   : > { %1632 = vtanh.f32 %v651_v7  ;;  %v385_v7 = vld [vmem:[%s2032_s19 + $0xe] sm:$0x3]  ;;  %s1093_s19 = sadd.s32 5, %s2044_s3 }
 0x3ff   : > { %412 = vst [vmem:[#allocation1 + $0x23] ss:$4 sm:$0xff] %v385_v7 }
 0x404   : > { %v1633_v8 = vpop.eup %1632 }
 0x405   : > { %655 = vrot.lane.b32.xlu2 %v1633_v8, %s1893_s22 }
 0x406   : > { %v414_v8 = vld.sshfl [vmem:[#allocation1 + $0x20] sm:$0xff pattern:$0x73625140] }
 0x407   : > { %1499 = vmatmul.msk.f32.gmra.mxu0 %vm415_vm3, %v414_v8 }
 0x45f   : > { %v656_v10 = vpop.permute.xlu2 %655 }
 0x460   : > { %v658_v12 = vmul.f32 %v656_v10, %v653_v9 }
 0x462   : > { %v2084_v13 = vadd.f32 %v659_v11, %v658_v12 }
 0x464   : > { %701 = vrot.lane.b32.xlu0 %v2084_v13, %s1893_s22 }
 0x4d6   : > { %v702_v14 = vpop.permute.xlu0 %701 }
 0x4d7   : > { %1504 = vmatmul.msk.f32.vlgmr.msra.gmra.mxu3 %vm477_vm2, %v702_v14 }
 0x55a   : > { %v722_v16 = vpop.f32.mrf.mxu3 }
 0x55b   : > { %v747_v17 = vadd.f32 %v722_v16, %v2058_v15  ;;  %v727_v20 = vadd.f32 %v726_v19, %v722_v16 }
 0x55d   : > { %749 = vrot.lane.b32.xlu1 %v747_v17, %s1892_s18  ;;  %v1505_v21 = vmul.f32 -1.442695, %v727_v20  ;;  %v440_v17 = vpop.f32.mrf.mxu0 }
 0x55f   : > { %1634 = vpow2.f32 %v1505_v21 }
 0x565   : > { %v1635_v22 = vpop.eup %1634 }
 0x566   : > { %v731_v23 = vadd.f32 1.0, %v1635_v22 }
 0x568   : > { %1636 = vrcp.f32 %v731_v23  ;;  %v743_v29 = vand.u32 2147483648, %v731_v23  ;;  %vm737_vm14 = vweird.f32 %v731_v23  ;;  %v741_v30 = vand.u32 2147483647, %v731_v23 }
 0x56a   : > { %v744_v32 = vor.u32 1.1754944e-38, %v743_v29  ;;  %vm742_vm0 = vcmp.eq.f32.partialorder %v741_v30, 8.507059e+37 }
 0x56e   : > { %v1637_v24 = vpop.eup %1636 }
 0x56f   : > { %v733_v25 = vmul.f32 %v1637_v24, %v731_v23  ;;  %vm738_vm13 = vweird.f32 %v1637_v24 }
 0x570   : > { %vm739_vm15 = vmor %vm737_vm14, %vm738_vm13 }
 0x571   : > { %v734_v26 = vsub.f32 1.0, %v733_v25 }
 0x573   : > { %v735_v27 = vmul.f32 %v1637_v24, %v734_v26 }
 0x575   : > { %v736_v28 = vadd.f32 %v1637_v24, %v735_v27 }
 0x577   : > { %v740_v31 = vsel %vm739_vm15, %v1637_v24, %v736_v28 }
 0x578   : > { %v745_v34 = vsel %vm742_vm0, %v744_v32, %v740_v31 }
 0x579   : > { %v759_v39 = vsub.f32 1.0, %v745_v34  ;;  %v765_v41 = vmul.f32 %v745_v34, %v2084_v13 }
 0x5cf   : > { %v750_v33 = vpop.permute.xlu1 %749 }
 0x5d0   : > { %v752_v35 = vmul.f32 %v750_v33, %v745_v34 }
 0x5d2   : > { %754 = vrot.lane.b32.xlu2 %v752_v35, %s1892_s18 }
 0x62c   : > { %v755_v36 = vpop.permute.xlu2 %754 }
 0x62d   : > { %v757_v37 = vadd.f32 %v755_v36, %v726_v19  ;;  %v441_v19 = vadd.f32 %v2064_v18, %v440_v17 }
 0x62f   : > { %1638 = vtanh.f32 %v757_v37  ;;  %v448_v20 = vrot.slane %v441_v19, 2  ;;  %v449_v21 = vrot.slane %v441_v19, 4  ;;  %v450_v22 = vrot.slane %v441_v19, 6  ;;  %462 = vst.msk [vmem:[#allocation2 + $0x8] sm:$0x3] %vm457_vm4, %v441_v19 }
 0x631   : > { %463 = vst.msk [vmem:[#allocation2 + $0xa] sm:$0x3] %vm457_vm4, %v448_v20 }
 0x632   : > { %464 = vst.msk [vmem:[#allocation2 + $0xc] sm:$0x3] %vm457_vm4, %v449_v21 }
 0x633   : > { %465 = vst.msk [vmem:[#allocation2 + $0xe] sm:$0x3] %vm457_vm4, %v450_v22 }
 0x635   : > { %v1639_v38 = vpop.eup %1638 }
 0x636   : > { %761 = vrot.lane.b32.xlu0 %v1639_v38, %s1893_s22  ;;  %v938_v25 = vld [vmem:[#allocation2 + $0x8] sm:$0x3] }
 0x639   : > { %v1150_v22 = vld [vmem:[#allocation2 + $0xc] sm:$0x3] }
 0x6a8   : > { %v762_v40 = vpop.permute.xlu0 %761 }
 0x6a9   : > { %v764_v42 = vmul.f32 %v762_v40, %v759_v39 }
 0x6ab   : > { %v2094_v43 = vadd.f32 %v765_v41, %v764_v42 }
 0x6ad   : > { %807 = vrot.lane.b32.xlu1 %v2094_v43, %s1893_s22 }
 0x71f   : > { %v808_v44 = vpop.permute.xlu1 %807 }
 0x720   : > { %1506 = vmatmul.msk.f32.vlgmr.msrb.gmra.mxu1 %vm477_vm2, %v808_v44 }
 0x79d   : > { %v828_v45 = vpop.f32.mrf.mxu1 }
 0x79e   : > { %v853_v46 = vadd.f32 %v828_v45, %v2058_v15  ;;  %v833_v48 = vadd.f32 %v832_v47, %v828_v45 }
 0x7a0   : > { %855 = vrot.lane.b32.xlu2 %v853_v46, %s1892_s18  ;;  %v1507_v50 = vmul.f32 -1.442695, %v833_v48 }
 0x7a2   : > { %1640 = vpow2.f32 %v1507_v50 }
 0x7a8   : > { %v1641_v51 = vpop.eup %1640 }
 0x7a9   : > { %v837_v52 = vadd.f32 1.0, %v1641_v51 }
 0x7ab   : > { %1642 = vrcp.f32 %v837_v52  ;;  %v849_v58 = vand.u32 2147483648, %v837_v52  ;;  %vm843_vm5 = vweird.f32 %v837_v52  ;;  %v847_v59 = vand.u32 2147483647, %v837_v52 }
 0x7ad   : > { %v850_v61 = vor.u32 1.1754944e-38, %v849_v58  ;;  %vm848_vm7 = vcmp.eq.f32.partialorder %v847_v59, 8.507059e+37 }
 0x7b1   : > { %v1643_v53 = vpop.eup %1642 }
 0x7b2   : > { %v839_v54 = vmul.f32 %v1643_v53, %v837_v52  ;;  %vm844_vm1 = vweird.f32 %v1643_v53 }
 0x7b3   : > { %vm845_vm6 = vmor %vm843_vm5, %vm844_vm1  ;;  %vm560_vm5 = vcmask 254976  }
 0x7b4   : > { %v840_v55 = vsub.f32 1.0, %v839_v54  ;;  %v1044_v54 = vld [vmem:[#allocation2 + $0xa] sm:$0x3] }
 0x7b6   : > { %v841_v56 = vmul.f32 %v1643_v53, %v840_v55 }
 0x7b8   : > { %v842_v57 = vadd.f32 %v1643_v53, %v841_v56 }
 0x7ba   : > { %v846_v60 = vsel %vm845_vm6, %v1643_v53, %v842_v57 }
 0x7bb   : > { %v851_v63 = vsel %vm848_vm7, %v850_v61, %v846_v60 }
 0x7bc   : > { %v865_v9 = vsub.f32 1.0, %v851_v63  ;;  %v871_v11 = vmul.f32 %v851_v63, %v2094_v43 }
 0x7fa   : > { %v856_v62 = vpop.permute.xlu2 %855 }
 0x7fb   : > { %v858_v0 = vmul.f32 %v856_v62, %v851_v63 }
 0x7fd   : > { %860 = vrot.lane.b32.xlu0 %v858_v0, %s1892_s18 }
 0x86f   : > { %v861_v1 = vpop.permute.xlu0 %860 }
 0x870   : > { %v863_v2 = vadd.f32 %v861_v1, %v832_v47 }
 0x872   : > { %1644 = vtanh.f32 %v863_v2 }
 0x878   : > { %v1645_v3 = vpop.eup %1644 }
 0x879   : > { %867 = vrot.lane.b32.xlu1 %v1645_v3, %s1893_s22 }
 0x8eb   : > { %v868_v10 = vpop.permute.xlu1 %867 }
 0x8ec   : > { %v870_v12 = vmul.f32 %v868_v10, %v865_v9 }
 0x8ee   : > { %v2109_v14 = vadd.f32 %v871_v11, %v870_v12 }
 0x8f0   : > { %913 = vrot.lane.b32.xlu2 %v2109_v14, %s1893_s22 }
 0x94a   : > { %v914_v16 = vpop.permute.xlu2 %913 }
 0x94b   : > { %1508 = vmatmul.msk.f32.vlgmr.msrb.gmra.mxu2 %vm477_vm2, %v914_v16 }
 0x9ce   : > { %v934_v23 = vpop.f32.mrf.mxu2 }
 0x9cf   : > { %v959_v24 = vadd.f32 %v934_v23, %v2058_v15  ;;  %v939_v26 = vadd.f32 %v938_v25, %v934_v23 }
 0x9d1   : > { %961 = vrot.lane.b32.xlu0 %v959_v24, %s1892_s18  ;;  %v1509_v27 = vmul.f32 -1.442695, %v939_v26 }
 0x9d3   : > { %1646 = vpow2.f32 %v1509_v27 }
 0x9d9   : > { %v1647_v18 = vpop.eup %1646 }
 0x9da   : > { %v943_v28 = vadd.f32 1.0, %v1647_v18 }
 0x9dc   : > { %1648 = vrcp.f32 %v943_v28  ;;  %v955_v34 = vand.u32 2147483648, %v943_v28  ;;  %vm949_vm4 = vweird.f32 %v943_v28  ;;  %v953_v35 = vand.u32 2147483647, %v943_v28 }
 0x9de   : > { %v956_v37 = vor.u32 1.1754944e-38, %v955_v34  ;;  %vm954_vm9 = vcmp.eq.f32.partialorder %v953_v35, 8.507059e+37 }
 0x9e2   : > { %v1649_v29 = vpop.eup %1648 }
 0x9e3   : > { %v945_v30 = vmul.f32 %v1649_v29, %v943_v28  ;;  %vm950_vm3 = vweird.f32 %v1649_v29 }
 0x9e4   : > { %vm951_vm8 = vmor %vm949_vm4, %vm950_vm3 }
 0x9e5   : > { %v946_v31 = vsub.f32 1.0, %v945_v30 }
 0x9e7   : > { %v947_v32 = vmul.f32 %v1649_v29, %v946_v31 }
 0x9e9   : > { %v948_v33 = vadd.f32 %v1649_v29, %v947_v32 }
 0x9eb   : > { %v952_v36 = vsel %vm951_vm8, %v1649_v29, %v948_v33 }
 0x9ec   : > { %v957_v39 = vsel %vm954_vm9, %v956_v37, %v952_v36 }
 0x9ed   : > { %v971_v45 = vsub.f32 1.0, %v957_v39  ;;  %v977_v47 = vmul.f32 %v957_v39, %v2109_v14 }
 0xa43   : > { %v962_v38 = vpop.permute.xlu0 %961 }
 0xa44   : > { %v964_v40 = vmul.f32 %v962_v38, %v957_v39  ;;  %v1621_v38 = vld [vmem:[%s2324_s7] ss:$0 sm:$0xff] }
 0xa46   : > { %966 = vrot.lane.b32.xlu1 %v964_v40, %s1892_s18 }
 0xab8   : > { %v967_v41 = vpop.permute.xlu1 %966 }
 0xab9   : > { %v969_v42 = vadd.f32 %v967_v41, %v938_v25 }
 0xabb   : > { %1650 = vtanh.f32 %v969_v42 }
 0xac1   : > { %v1651_v44 = vpop.eup %1650 }
 0xac2   : > { %973 = vrot.lane.b32.xlu2 %v1651_v44, %s1893_s22 }
 0xb1c   : > { %v974_v46 = vpop.permute.xlu2 %973 }
 0xb1d   : > { %v976_v48 = vmul.f32 %v974_v46, %v971_v45 }
 0xb1f   : > { %v2124_v50 = vadd.f32 %v977_v47, %v976_v48 }
 0xb21   : > { %1019 = vrot.lane.b32.xlu0 %v2124_v50, %s1893_s22 }
 0xb93   : > { %v1020_v51 = vpop.permute.xlu0 %1019 }
 0xb94   : > { %1510 = vmatmul.msk.f32.vlgmr.msrb.gmra.mxu3 %vm477_vm2, %v1020_v51 }
 0xc17   : > { %v1040_v52 = vpop.f32.mrf.mxu3 }
 0xc18   : > { %v1065_v53 = vadd.f32 %v1040_v52, %v2058_v15  ;;  %v1045_v55 = vadd.f32 %v1044_v54, %v1040_v52 }
 0xc1a   : > { %1067 = vrot.lane.b32.xlu1 %v1065_v53, %s1892_s18  ;;  %v1511_v56 = vmul.f32 -1.442695, %v1045_v55  ;;  %v2162_v55 = vld [vmem:[%s2319_s2] sm:$0x3] }
 0xc1c   : > { %1652 = vpow2.f32 %v1511_v56  ;;  %v564_v56 = vstv %s2044_s3 }
 0xc1d   : > { %vm2166_vm6 = vcmp.lt.s32.totalorder %v564_v56, %v2162_v55 }
 0xc22   : > { %v1653_v57 = vpop.eup %1652 }
 0xc23   : > { %v1049_v58 = vadd.f32 1.0, %v1653_v57 }
 0xc25   : > { %1654 = vrcp.f32 %v1049_v58  ;;  %v1061_v0 = vand.u32 2147483648, %v1049_v58  ;;  %vm1055_vm11 = vweird.f32 %v1049_v58  ;;  %v1059_v1 = vand.u32 2147483647, %v1049_v58 }
 0xc27   : > { %v1062_v3 = vor.u32 1.1754944e-38, %v1061_v0  ;;  %vm1060_vm13 = vcmp.eq.f32.partialorder %v1059_v1, 8.507059e+37 }
 0xc2b   : > { %v1655_v59 = vpop.eup %1654 }
 0xc2c   : > { %v1051_v60 = vmul.f32 %v1655_v59, %v1049_v58  ;;  %vm1056_vm10 = vweird.f32 %v1655_v59 }
 0xc2d   : > { %vm1057_vm12 = vmor %vm1055_vm11, %vm1056_vm10 }
 0xc2e   : > { %v1052_v61 = vsub.f32 1.0, %v1051_v60  ;;  %v474_v60 = vld [vmem:[#allocation4] sm:$0x3] }
 0xc30   : > { %v1053_v62 = vmul.f32 %v1655_v59, %v1052_v61 }
 0xc32   : > { %v1054_v63 = vadd.f32 %v1655_v59, %v1053_v62 }
 0xc34   : > { %v1058_v2 = vsel %vm1057_vm12, %v1655_v59, %v1054_v63  ;;  %v1894_v59 = vmov 0  }
 0xc35   : > { %v1063_v5 = vsel %vm1060_vm13, %v1062_v3, %v1058_v2  ;;  %1616 = vset.pattern.permute.xlu1 %v1894_v59  ;;  %1617 = vset.pattern.permute.xlu0 %v1894_v59 }
 0xc36   : > { %v1077_v10 = vsub.f32 1.0, %v1063_v5  ;;  %v1083_v12 = vmul.f32 %v1063_v5, %v2124_v50  ;;  %1618 = vset.pattern.permute.xlu2 %v1894_v59 }
 0xc8c   : > { %v1068_v4 = vpop.permute.xlu1 %1067 }
 0xc8d   : > { %v1070_v6 = vmul.f32 %v1068_v4, %v1063_v5 }
 0xc8f   : > { %1072 = vrot.lane.b32.xlu2 %v1070_v6, %s1892_s18  ;;  %v2179_v6 = vld [vmem:[#allocation2 + $0xe] sm:$0x3] }
 0xce9   : > { %v1073_v7 = vpop.permute.xlu2 %1072 }
 0xcea   : > { %v1075_v8 = vadd.f32 %v1073_v7, %v1044_v54 }
 0xcec   : > { %1656 = vtanh.f32 %v1075_v8 }
 0xcf2   : > { %v1657_v9 = vpop.eup %1656 }
 0xcf3   : > { %1079 = vrot.lane.b32.xlu0 %v1657_v9, %s1893_s22 }
 0xd65   : > { %v1080_v11 = vpop.permute.xlu0 %1079 }
 0xd66   : > { %v1082_v16 = vmul.f32 %v1080_v11, %v1077_v10 }
 0xd68   : > { %v2134_v17 = vadd.f32 %v1083_v12, %v1082_v16 }
 0xd6a   : > { %1125 = vrot.lane.b32.xlu1 %v2134_v17, %s1893_s22 }
 0xddc   : > { %v1126_v19 = vpop.permute.xlu1 %1125 }
 0xddd   : > { %1512 = vmatmul.msk.f32.vlgmr.msrb.gmra.mxu0 %vm477_vm2, %v1126_v19 }
 0xe5a   : > { %v1146_v20 = vpop.f32.mrf.mxu0 }
 0xe5b   : > { %v1171_v21 = vadd.f32 %v1146_v20, %v2058_v15  ;;  %v1151_v23 = vadd.f32 %v1150_v22, %v1146_v20 }
 0xe5d   : > { %1173 = vrot.lane.b32.xlu2 %v1171_v21, %s1892_s18  ;;  %v1513_v24 = vmul.f32 -1.442695, %v1151_v23 }
 0xe5f   : > { %1658 = vpow2.f32 %v1513_v24 }
 0xe65   : > { %v1659_v25 = vpop.eup %1658 }
 0xe66   : > { %v1155_v26 = vadd.f32 1.0, %v1659_v25 }
 0xe68   : > { %1660 = vrcp.f32 %v1155_v26  ;;  %v1167_v31 = vand.u32 2147483648, %v1155_v26  ;;  %vm1161_vm15 = vweird.f32 %v1155_v26  ;;  %v1165_v32 = vand.u32 2147483647, %v1155_v26 }
 0xe6a   : > { %v1168_v34 = vor.u32 1.1754944e-38, %v1167_v31  ;;  %vm1166_vm1 = vcmp.eq.f32.partialorder %v1165_v32, 8.507059e+37 }
 0xe6e   : > { %v1661_v27 = vpop.eup %1660 }
 0xe6f   : > { %v1157_v18 = vmul.f32 %v1661_v27, %v1155_v26  ;;  %vm1162_vm14 = vweird.f32 %v1661_v27 }
 0xe70   : > { %vm1163_vm0 = vmor %vm1161_vm15, %vm1162_vm14  ;;  %vm1341_vm15 = vcmask 1024  }
 0xe71   : > { %v1158_v28 = vsub.f32 1.0, %v1157_v18 }
 0xe73   : > { %v1159_v29 = vmul.f32 %v1661_v27, %v1158_v28 }
 0xe75   : > { %v1160_v30 = vadd.f32 %v1661_v27, %v1159_v29 }
 0xe77   : > { %v1164_v33 = vsel %vm1163_vm0, %v1661_v27, %v1160_v30 }
 0xe78   : > { %v1169_v36 = vsel %vm1166_vm1, %v1168_v34, %v1164_v33  ;;  %v670_v34 = vstv %s669_s27 }
 0xe79   : > { %v1183_v45 = vsub.f32 1.0, %v1169_v36  ;;  %v1189_v47 = vmul.f32 %v1169_v36, %v2134_v17  ;;  %vm671_vm8 = vcmp.lt.s32.totalorder %v670_v34, %v2162_v55  ;;  %v988_v34 = vstv %s987_s20 }
 0xe7a   : > { %vm989_vm11 = vcmp.lt.s32.totalorder %v988_v34, %v2162_v55 }
 0xeb7   : > { %v1174_v35 = vpop.permute.xlu2 %1173 }
 0xeb8   : > { %v1176_v37 = vmul.f32 %v1174_v35, %v1169_v36 }
 0xeba   : > { %1178 = vrot.lane.b32.xlu0 %v1176_v37, %s1892_s18 }
 0xec2   : > { %552 = vrot.lane.b32.xlu0 %v1621_v38, %s1891_s0  ;;  %s1305_s0 = sadd.s32 7, %s2044_s3 }
 0xf2c   : > { %v1179_v39 = vpop.permute.xlu0 %1178 }
 0xf2d   : > { %v1181_v40 = vadd.f32 %v1179_v39, %v1150_v22  ;;  %v475_v39 = vld [vmem:[#allocation5] sm:$0x3] }
 0xf2f   : > { %1662 = vtanh.f32 %v1181_v40 }
 0xf34   : > { %v2147_v42 = vpop.permute.xlu0 %552 }
 0xf35   : > { %v1663_v41 = vpop.eup %1662  ;;  %v555_v44 = vmul.f32 %v2147_v42, %v2074_v49  ;;  %v661_v5 = vmul.f32 %v2084_v13, %v2147_v42  ;;  %v767_v57 = vmul.f32 %v2094_v43, %v2147_v42 }
 0xf36   : > { %1185 = vrot.lane.b32.xlu1 %v1663_v41, %s1893_s22 }
 0xf3e   : > { %557 = vrot.lane.b32.xlu1 %v555_v44, %s1893_s22 }
 0xfa8   : > { %v1186_v46 = vpop.permute.xlu1 %1185 }
 0xfa9   : > { %v1188_v48 = vmul.f32 %v1186_v46, %v1183_v45 }
 0xfab   : > { %v2153_v51 = vadd.f32 %v1189_v47, %v1188_v48 }
 0xfad   : > { %1231 = vrot.lane.b32.xlu2 %v2153_v51, %s1893_s22 }
 0xfb0   : > { %v558_v52 = vpop.permute.xlu1 %557 }
 0xfb1   : > { %v561_v53 = vsel %vm560_vm5, %v558_v52, 0.0 }
 0xfd6   : > { %562 = vadd.xlane.f32.xlu2 %v561_v53 }
0x1007   : > { %v1232_v54 = vpop.permute.xlu2 %1231 }
0x1008   : > { %1514 = vmatmul.msk.f32.vlgmr.msra.gmra.mxu1 %vm477_vm2, %v1232_v54 }
0x1049   : > { %v563_v58 = vpop.xlane.xlu2 %562 }
0x104a   : > { %v566_v61 = vsel %vm2166_vm6, %v563_v58, -1e+30 }
0x104b   : > { %v567_v62 = vmax.f32 %v474_v60, %v566_v61 }
0x104d   : > { %v571_v63 = vsub.f32 %v566_v61, %v567_v62  ;;  %v568_v30 = vsub.f32 %v474_v60, %v567_v62 }
0x104f   : > { %v572_v0 = vmul.f32 1.442695, %v571_v63  ;;  %v569_v31 = vmul.f32 1.442695, %v568_v30 }
0x1051   : > { %1664 = vpow2.f32 %v572_v0 }
0x1057   : > { %v1665_v3 = vpop.eup %1664 }
0x1058   : > { %v574_v4 = vsel %vm2166_vm6, %v1665_v3, 0.0 }
0x1085   : > { %v1252_v1 = vpop.f32.mrf.mxu1 }
0x1086   : > { %v1277_v2 = vadd.f32 %v1252_v1, %v2058_v15  ;;  %v1257_v7 = vadd.f32 %v2179_v6, %v1252_v1 }
0x1088   : > { %1279 = vrot.lane.b32.xlu1 %v1277_v2, %s1892_s18  ;;  %v1515_v8 = vmul.f32 -1.442695, %v1257_v7 }
0x108a   : > { %1666 = vpow2.f32 %v1515_v8 }
0x1090   : > { %585 = vperm.xlu1 %1616, %v574_v4   ;;  %v1667_v9 = vpop.eup %1666 }
0x1091   : > { %v1261_v15 = vadd.f32 1.0, %v1667_v9 }
0x1093   : > { %1668 = vrcp.f32 %v1261_v15  ;;  %v1273_v20 = vand.u32 2147483648, %v1261_v15  ;;  %vm1267_vm7 = vweird.f32 %v1261_v15  ;;  %v1271_v21 = vand.u32 2147483647, %v1261_v15 }
0x1094   : > { %1670 = vpow2.f32 %v569_v31 }
0x1095   : > { %v1274_v23 = vor.u32 1.1754944e-38, %v1273_v20  ;;  %vm1272_vm4 = vcmp.eq.f32.partialorder %v1271_v21, 8.507059e+37  ;;  %v979_v21 = vmul.f32 %v2124_v50, %v2147_v42 }
0x1098   : > { %663 = vrot.lane.b32.xlu1 %v661_v5, %s1893_s22 }
0x1099   : > { %v1669_v10 = vpop.eup %1668 }
0x109a   : > { %v1263_v11 = vmul.f32 %v1669_v10, %v1261_v15  ;;  %vm1268_vm2 = vweird.f32 %v1669_v10  ;;  %v1671_v32 = vpop.eup %1670 }
0x109b   : > { %vm1269_vm3 = vmor %vm1267_vm7, %vm1268_vm2  ;;  %v575_v44 = vmul.f32 %v1671_v32, %v475_v39 }
0x109c   : > { %v1264_v12 = vsub.f32 1.0, %v1263_v11 }
0x109d   : > { %v576_v45 = vadd.f32 %v575_v44, %v574_v4 }
0x109e   : > { %v1265_v16 = vmul.f32 %v1669_v10, %v1264_v12 }
0x10a0   : > { %v1266_v19 = vadd.f32 %v1669_v10, %v1265_v16 }
0x10a2   : > { %v1270_v22 = vsel %vm1269_vm3, %v1669_v10, %v1266_v19 }
0x10a3   : > { %v2182_v24 = vsel %vm1272_vm4, %v1274_v23, %v1270_v22  ;;  %v1085_v22 = vmul.f32 %v2134_v17, %v2147_v42 }
0x10fa   : > { %v1280_v25 = vpop.permute.xlu1 %1279 }
0x10fb   : > { %v1282_v26 = vmul.f32 %v1280_v25, %v2182_v24 }
0x10fd   : > { %1284 = vrot.lane.b32.xlu1 %v1282_v26, %s1892_s18 }
0x1102   : > { %v586_v27 = vpop.permute.xlu1 %585 }
0x1103   : > { %v588_v18 = vmul.f32 %v586_v27, %v2074_v49 }
0x1105   : > { %590 = vrot.lane.b32.xlu0 %v588_v18, %s1893_s22 }
0x110a   : > { %v664_v28 = vpop.permute.xlu1 %663 }
0x110b   : > { %v666_v29 = vsel %vm560_vm5, %v664_v28, 0.0 }
0x112f   : > { %667 = vadd.xlane.f32.xlu0 %v666_v29  ;;  %v882_v29 = vstv %s881_s17 }
0x1130   : > { %vm883_vm10 = vcmp.lt.s32.totalorder %v882_v29, %v2162_v55 }
0x1143   : > { %579 = vperm.xlu0 %1617, %v1671_v32  }
0x116f   : > { %v1285_v58 = vpop.permute.xlu1 %1284 }
0x1170   : > { %v1287_v7 = vadd.f32 %v1285_v58, %v2179_v6  ;;  %v873_v6 = vmul.f32 %v2109_v14, %v2147_v42 }
0x1177   : > { %v2189_v33 = vpop.permute.xlu0 %590 }
0x11a2   : > { %v668_v35 = vpop.xlane.xlu0 %667 }
0x11a3   : > { %v672_v49 = vsel %vm671_vm8, %v668_v35, -1e+30 }
0x11a4   : > { %v673_v36 = vmax.f32 %v567_v62, %v672_v49 }
0x11a6   : > { %v674_v37 = vsub.f32 %v567_v62, %v673_v36  ;;  %v677_v38 = vsub.f32 %v672_v49, %v673_v36  ;;  %v1191_v62 = vmul.f32 %v2153_v51, %v2147_v42 }
0x11a8   : > { %v675_v40 = vmul.f32 1.442695, %v674_v37  ;;  %v678_v41 = vmul.f32 1.442695, %v677_v38 }
0x11aa   : > { %1672 = vpow2.f32 %v675_v40 }
0x11ab   : > { %1674 = vpow2.f32 %v678_v41  ;;  %v1289_v41 = vsub.f32 1.0, %v2182_v24 }
0x11b0   : > { %v2195_v46 = vpop.eup %1672 }
0x11b1   : > { %v1675_v47 = vpop.eup %1674  ;;  %v681_v48 = vmul.f32 %v2195_v46, %v576_v45 }
0x11b2   : > { %v680_v52 = vsel %vm671_vm8, %v1675_v47, 0.0 }
0x11b3   : > { %691 = vperm.xlu2 %1618, %v680_v52   ;;  %v682_v53 = vadd.f32 %v681_v48, %v680_v52 }
0x11b5   : > { %v2219_v16 = vpop.permute.xlu0 %579 }
0x120d   : > { %v692_v54 = vpop.permute.xlu2 %691 }
0x120e   : > { %v694_v56 = vmul.f32 %v692_v54, %v2084_v13  ;;  %v776_v13 = vstv %s775_s29 }
0x120f   : > { %vm777_vm9 = vcmp.lt.s32.totalorder %v776_v13, %v2162_v55 }
0x1210   : > { %696 = vrot.lane.b32.xlu1 %v694_v56, %s1893_s22  ;;  %v1295_v56 = vmul.f32 %v2182_v24, %v2153_v51 }
0x1218   : > { %769 = vrot.lane.b32.xlu1 %v767_v57, %s1893_s22 }
0x1282   : > { %v2205_v59 = vpop.permute.xlu1 %696 }
0x128a   : > { %v770_v60 = vpop.permute.xlu1 %769 }
0x128b   : > { %v772_v61 = vsel %vm560_vm5, %v770_v60, 0.0 }
0x128c   : > { %773 = vadd.xlane.f32.xlu1 %v772_v61 }
0x12a5   : > { %1193 = vrot.lane.b32.xlu1 %v1191_v62, %s1893_s22 }
0x12ff   : > { %v774_v63 = vpop.xlane.xlu1 %773 }
0x1300   : > { %v778_v0 = vsel %vm777_vm9, %v774_v63, -1e+30 }
0x1301   : > { %v779_v1 = vmax.f32 %v673_v36, %v778_v0 }
0x1303   : > { %v780_v2 = vsub.f32 %v673_v36, %v779_v1  ;;  %v783_v3 = vsub.f32 %v778_v0, %v779_v1 }
0x1305   : > { %v781_v4 = vmul.f32 1.442695, %v780_v2  ;;  %v784_v5 = vmul.f32 1.442695, %v783_v3 }
0x1307   : > { %1676 = vpow2.f32 %v781_v4 }
0x1308   : > { %1678 = vpow2.f32 %v784_v5 }
0x1309   : > { %1680 = vtanh.f32 %v1287_v7 }
0x130d   : > { %v1677_v8 = vpop.eup %1676 }
0x130e   : > { %v1679_v9 = vpop.eup %1678  ;;  %791 = vperm.xlu2 %1618, %v1677_v8   ;;  %v787_v15 = vmul.f32 %v1677_v8, %v682_v53 }
0x130f   : > { %v786_v10 = vsel %vm777_vm9, %v1679_v9, 0.0  ;;  %v1681_v12 = vpop.eup %1680 }
0x1310   : > { %797 = vperm.xlu0 %1617, %v786_v10   ;;  %v788_v11 = vadd.f32 %v787_v15, %v786_v10 }
0x1316   : > { %1291 = vrot.lane.b32.xlu2 %v1681_v12, %s1893_s22  ;;  %v1094_v12 = vstv %s1093_s19 }
0x1317   : > { %v1194_v10 = vpop.permute.xlu1 %1193  ;;  %vm1095_vm12 = vcmp.lt.s32.totalorder %v1094_v12, %v2162_v55 }
0x1382   : > { %v798_v19 = vpop.permute.xlu0 %797 }
0x1383   : > { %v800_v20 = vmul.f32 %v798_v19, %v2094_v43  ;;  %v2232_v43 = vpop.permute.xlu2 %791 }
0x1385   : > { %802 = vrot.lane.b32.xlu2 %v800_v20, %s1893_s22 }
0x138b   : > { %v1292_v23 = vpop.permute.xlu2 %1291 }
0x138c   : > { %v1294_v47 = vmul.f32 %v1292_v23, %v1289_v41  ;;  %v476_v41 = vld [vmem:[#allocation6] sm:$0x3] }
0x138d   : > { %875 = vrot.lane.b32.xlu2 %v873_v6, %s1893_s22 }
0x138e   : > { %v2251_v60 = vadd.f32 %v1295_v56, %v1294_v47  ;;  %v582_v47 = vmul.f32 %v2219_v16, %v476_v41 }
0x1390   : > { %v1297_v62 = vmul.f32 %v2251_v60, %v2147_v42 }
0x1395   : > { %981 = vrot.lane.b32.xlu2 %v979_v21, %s1893_s22 }
0x139d   : > { %1087 = vrot.lane.b32.xlu2 %v1085_v22, %s1893_s22 }
0x13df   : > { %v2234_v25 = vpop.permute.xlu2 %802 }
0x13e7   : > { %v876_v26 = vpop.permute.xlu2 %875 }
0x13e8   : > { %v878_v27 = vsel %vm560_vm5, %v876_v26, 0.0 }
0x13e9   : > { %879 = vadd.xlane.f32.xlu0 %v878_v27 }
0x13ef   : > { %v982_v18 = vpop.permute.xlu2 %981 }
0x13f0   : > { %v984_v28 = vsel %vm560_vm5, %v982_v18, 0.0 }
0x13f1   : > { %985 = vadd.xlane.f32.xlu0 %v984_v28 }
0x13f7   : > { %v1088_v2 = vpop.permute.xlu2 %1087 }
0x13f8   : > { %v1090_v3 = vsel %vm560_vm5, %v1088_v2, 0.0 }
0x145c   : > { %v880_v30 = vpop.xlane.xlu0 %879 }
0x145d   : > { %v884_v31 = vsel %vm883_vm10, %v880_v30, -1e+30 }
0x145e   : > { %v885_v32 = vmax.f32 %v779_v1, %v884_v31 }
0x1460   : > { %v886_v35 = vsub.f32 %v779_v1, %v885_v32  ;;  %v889_v49 = vsub.f32 %v884_v31, %v885_v32  ;;  %v1200_v31 = vstv %s1199_s5 }
0x1461   : > { %vm1201_vm13 = vcmp.lt.s32.totalorder %v1200_v31, %v2162_v55 }
0x1462   : > { %v887_v36 = vmul.f32 1.442695, %v886_v35  ;;  %v890_v37 = vmul.f32 1.442695, %v889_v49 }
0x1464   : > { %1682 = vpow2.f32 %v887_v36  ;;  %v986_v38 = vpop.xlane.xlu0 %985 }
0x1465   : > { %1684 = vpow2.f32 %v890_v37  ;;  %v990_v39 = vsel %vm989_vm11, %v986_v38, -1e+30 }
0x1466   : > { %v991_v40 = vmax.f32 %v885_v32, %v990_v39 }
0x1468   : > { %v992_v44 = vsub.f32 %v885_v32, %v991_v40  ;;  %v995_v45 = vsub.f32 %v990_v39, %v991_v40 }
0x146a   : > { %v1683_v48 = vpop.eup %1682  ;;  %v993_v52 = vmul.f32 1.442695, %v992_v44  ;;  %v996_v53 = vmul.f32 1.442695, %v995_v45 }
0x146b   : > { %v1685_v54 = vpop.eup %1684  ;;  %897 = vperm.xlu2 %1618, %v1683_v48   ;;  %v893_v57 = vmul.f32 %v1683_v48, %v788_v11  ;;  %v1196_v11 = vsel %vm560_vm5, %v1194_v10, 0.0  ;;  %v593_v48 = vadd.f32 %v2189_v33, %v582_v47 }
0x146c   : > { %1686 = vpow2.f32 %v993_v52  ;;  %v892_v58 = vsel %vm883_vm10, %v1685_v54, 0.0 }
0x146d   : > { %1688 = vpow2.f32 %v996_v53  ;;  %v894_v61 = vadd.f32 %v893_v57, %v892_v58 }
0x1472   : > { %v1687_v13 = vpop.eup %1686 }
0x1473   : > { %v1689_v63 = vpop.eup %1688  ;;  %1299 = vrot.lane.b32.xlu2 %v1297_v62, %s1893_s22  ;;  %1003 = vperm.xlu0 %1617, %v1687_v13   ;;  %v999_v0 = vmul.f32 %v1687_v13, %v894_v61 }
0x1474   : > { %v998_v24 = vsel %vm989_vm11, %v1689_v63, 0.0 }
0x1475   : > { %v1000_v1 = vadd.f32 %v999_v0, %v998_v24 }
0x147b   : > { %903 = vperm.xlu2 %1618, %v892_v58   ;;  %1009 = vperm.xlu0 %1617, %v998_v24  }
0x14a4   : > { %1091 = vadd.xlane.f32.xlu2 %v1090_v3 }
0x14c5   : > { %v898_v4 = vpop.permute.xlu2 %897 }
0x14cd   : > { %v1300_v5 = vpop.permute.xlu2 %1299 }
0x14ce   : > { %v1302_v29 = vsel %vm560_vm5, %v1300_v5, 0.0 }
0x14d5   : > { %v904_v42 = vpop.permute.xlu2 %903 }
0x14d6   : > { %v906_v7 = vmul.f32 %v904_v42, %v2109_v14 }
0x14d8   : > { %908 = vrot.lane.b32.xlu1 %v906_v7, %s1893_s22 }
0x14e5   : > { %v1004_v8 = vpop.permute.xlu0 %1003 }
0x14ed   : > { %v1010_v9 = vpop.permute.xlu0 %1009 }
0x14ee   : > { %v1012_v15 = vmul.f32 %v1010_v9, %v2124_v50 }
0x14f0   : > { %1014 = vrot.lane.b32.xlu2 %v1012_v15, %s1893_s22 }
0x1502   : > { %1197 = vadd.xlane.f32.xlu1 %v1196_v11 }
0x1517   : > { %v1092_v19 = vpop.xlane.xlu2 %1091 }
0x1518   : > { %v1096_v20 = vsel %vm1095_vm12, %v1092_v19, -1e+30 }
0x1519   : > { %v1097_v6 = vmax.f32 %v991_v40, %v1096_v20 }
0x151b   : > { %v1098_v14 = vsub.f32 %v991_v40, %v1097_v6  ;;  %v1101_v21 = vsub.f32 %v1096_v20, %v1097_v6  ;;  %685 = vperm.xlu1 %1616, %v2195_v46  }
0x151d   : > { %v1099_v22 = vmul.f32 1.442695, %v1098_v14  ;;  %v1102_v50 = vmul.f32 1.442695, %v1101_v21 }
0x151f   : > { %1690 = vpow2.f32 %v1099_v22 }
0x1520   : > { %1692 = vpow2.f32 %v1102_v50 }
0x1525   : > { %v1691_v23 = vpop.eup %1690 }
0x1526   : > { %v1693_v26 = vpop.eup %1692  ;;  %1109 = vperm.xlu0 %1617, %v1691_v23   ;;  %v1105_v27 = vmul.f32 %v1691_v23, %v1000_v1  ;;  %v1306_v1 = vstv %s1305_s0 }
0x1527   : > { %v1104_v18 = vsel %vm1095_vm12, %v1693_v26, 0.0  ;;  %vm1307_vm14 = vcmp.lt.s32.totalorder %v1306_v1, %v2162_v55 }
0x1528   : > { %v1106_v28 = vadd.f32 %v1105_v27, %v1104_v18  ;;  %1115 = vperm.xlu1 %1616, %v1104_v18  }
0x154a   : > { %v909_v30 = vpop.permute.xlu1 %908  ;;  %v1015_v63 = vpop.permute.xlu2 %1014 }
0x1550   : > { %1303 = vadd.xlane.f32.xlu0 %v1302_v29 }
0x1575   : > { %v1198_v46 = vpop.xlane.xlu1 %1197 }
0x1576   : > { %v1202_v32 = vsel %vm1201_vm13, %v1198_v46, -1e+30 }
0x1577   : > { %v1203_v34 = vmax.f32 %v1097_v6, %v1202_v32 }
0x1579   : > { %v1204_v35 = vsub.f32 %v1097_v6, %v1203_v34  ;;  %v1207_v49 = vsub.f32 %v1202_v32, %v1203_v34 }
0x157b   : > { %v1205_v36 = vmul.f32 1.442695, %v1204_v35  ;;  %v1208_v37 = vmul.f32 1.442695, %v1207_v49 }
0x157d   : > { %1694 = vpow2.f32 %v1205_v36 }
0x157e   : > { %1696 = vpow2.f32 %v1208_v37 }
0x1583   : > { %v1695_v38 = vpop.eup %1694 }
0x1584   : > { %v1697_v39 = vpop.eup %1696  ;;  %v1211_v40 = vmul.f32 %v1695_v38, %v1106_v28 }
0x1585   : > { %v1210_v44 = vsel %vm1201_vm13, %v1697_v39, 0.0 }
0x1586   : > { %1221 = vperm.xlu2 %1618, %v1210_v44   ;;  %v1212_v45 = vadd.f32 %v1211_v40, %v1210_v44 }
0x158d   : > { %v686_v52 = vpop.permute.xlu1 %685 }
0x158e   : > { %v688_v53 = vmul.f32 %v686_v52, %v593_v48 }
0x1590   : > { %v699_v54 = vadd.f32 %v2205_v59, %v688_v53 }
0x1592   : > { %v794_v56 = vmul.f32 %v2232_v43, %v699_v54 }
0x1594   : > { %v805_v57 = vadd.f32 %v2234_v25, %v794_v56 }
0x1596   : > { %v900_v58 = vmul.f32 %v898_v4, %v805_v57 }
0x1598   : > { %v911_v61 = vadd.f32 %v909_v30, %v900_v58  ;;  %v1110_v16 = vpop.permute.xlu0 %1109 }
0x159a   : > { %v1006_v62 = vmul.f32 %v1004_v8, %v911_v61  ;;  %v1116_v13 = vpop.permute.xlu1 %1115 }
0x159b   : > { %v1118_v0 = vmul.f32 %v1116_v13, %v2134_v17 }
0x159c   : > { %v1017_v24 = vadd.f32 %v1015_v63, %v1006_v62 }
0x159d   : > { %1120 = vrot.lane.b32.xlu0 %v1118_v0, %s1893_s22 }
0x159e   : > { %v1112_v33 = vmul.f32 %v1110_v16, %v1017_v24 }
0x15a5   : > { %1215 = vperm.xlu0 %1617, %v1695_v38  }
0x15c3   : > { %v1304_v59 = vpop.xlane.xlu0 %1303 }
0x15c4   : > { %v1308_v43 = vsel %vm1307_vm14, %v1304_v59, -1e+30 }
0x15c5   : > { %v1309_v25 = vmax.f32 %v1203_v34, %v1308_v43 }
0x15c7   : > { %v1310_v2 = vsub.f32 %v1203_v34, %v1309_v25  ;;  %v1313_v3 = vsub.f32 %v1308_v43, %v1309_v25  ;;  %1342 = vst.msk [vmem:[#allocation4] sm:$0x3] %vm1341_vm15, %v1309_v25 }
0x15c9   : > { %v1311_v17 = vmul.f32 1.442695, %v1310_v2  ;;  %v1314_v4 = vmul.f32 1.442695, %v1313_v3 }
0x15cb   : > { %1698 = vpow2.f32 %v1311_v17 }
0x15cc   : > { %1700 = vpow2.f32 %v1314_v4 }
0x15d1   : > { %v1699_v5 = vpop.eup %1698 }
0x15d2   : > { %v1701_v42 = vpop.eup %1700  ;;  %1321 = vperm.xlu2 %1618, %v1699_v5   ;;  %v1317_v7 = vmul.f32 %v1699_v5, %v1212_v45 }
0x15d3   : > { %v1316_v8 = vsel %vm1307_vm14, %v1701_v42, 0.0 }
0x15d4   : > { %v1318_v9 = vadd.f32 %v1317_v7, %v1316_v8  ;;  %1327 = vperm.xlu0 %1617, %v1316_v8  }
0x15d6   : > { %1343 = vst.msk [vmem:[#allocation5] sm:$0x3] %vm1341_vm15, %v1318_v9 }
0x15e0   : > { %v1222_v15 = vpop.permute.xlu2 %1221 }
0x15e1   : > { %v1224_v10 = vmul.f32 %v1222_v15, %v2153_v51 }
0x15e3   : > { %1226 = vrot.lane.b32.xlu1 %v1224_v10, %s1893_s22 }
0x15eb   : > { %1337 = vrot.lane.b32.xlu1 %v2251_v60, %s1893_s22 }
0x160f   : > { %v1121_v11 = vpop.permute.xlu0 %1120 }
0x1610   : > { %v1123_v12 = vadd.f32 %v1121_v11, %v1112_v33 }
0x1617   : > { %v1216_v19 = vpop.permute.xlu0 %1215 }
0x1618   : > { %v1218_v20 = vmul.f32 %v1216_v19, %v1123_v12 }
0x162c   : > { %v1322_v51 = vpop.permute.xlu2 %1321 }
0x1646   : > { %v1328_v6 = vpop.permute.xlu0 %1327 }
0x1647   : > { %v1330_v55 = vmul.f32 %v1328_v6, %v2251_v60 }
0x1649   : > { %1332 = vrot.lane.b32.xlu0 %v1330_v55, %s1893_s22 }
0x1655   : > { %v1227_v14 = vpop.permute.xlu1 %1226 }
0x1656   : > { %v1229_v21 = vadd.f32 %v1227_v14, %v1218_v20 }
0x1658   : > { %v1324_v50 = vmul.f32 %v1322_v51, %v1229_v21 }
0x165d   : > { %v1338_v22 = vpop.permute.xlu1 %1337 }
0x165e   : > { %1340 = vst.msk [vmem:[#allocation3] sm:$0x3] %vm560_vm5, %v1338_v22 }
0x16bb   : > { %v1333_v23 = vpop.permute.xlu0 %1332 }
0x16bc   : > { %v1335_v26 = vadd.f32 %v1333_v23, %v1324_v50 }
0x16be   : > { %1344 = vst.msk [vmem:[#allocation6] sm:$0x3] %vm560_vm5, %v1335_v26 }
0x16bf PF: > { %p1516_p1 = scmp.ne.s32.totalorder %s1873_s10, 1 }
0x16c1   : > { %1348 = sbr.rel (%p1516_p1) target bundleno = 5968 (0x1750), region = 72 }
0x16c6   : > { %v1349_v27 = vld [vmem:[#allocation5] sm:$0x3]  ;;  %v1895_v18 = vmov 0   ;;  %v1351_v37 = vld [vmem:[#allocation6] sm:$0x3]  ;;  %vm1372_vm2 = vcmask 254976  }
0x16c7   : > { %1702 = vset.pattern.permute.xlu0 %v1895_v18  ;;  %v1350_v60 = vmax.f32 %v1349_v27, 1e-30 }
0x16c9   : > { %1703 = vrcp.f32 %v1350_v60  ;;  %v1363_v30 = vand.u32 2147483648, %v1350_v60  ;;  %vm1357_vm0 = vweird.f32 %v1350_v60  ;;  %v1361_v46 = vand.u32 2147483647, %v1350_v60 }
0x16cb   : > { %v1364_v34 = vor.u32 1.1754944e-38, %v1363_v30  ;;  %vm1362_vm5 = vcmp.eq.f32.partialorder %v1361_v46, 8.507059e+37 }
0x16cf   : > { %v1704_v28 = vpop.eup %1703 }
0x16d0   : > { %v1353_v29 = vmul.f32 %v1704_v28, %v1350_v60  ;;  %vm1358_vm1 = vweird.f32 %v1704_v28 }
0x16d1   : > { %vm1359_vm6 = vmor %vm1357_vm0, %vm1358_vm1 }
0x16d2   : > { %v1354_v31 = vsub.f32 1.0, %v1353_v29 }
0x16d4   : > { %v1355_v32 = vmul.f32 %v1704_v28, %v1354_v31 }
0x16d6   : > { %v1356_v35 = vadd.f32 %v1704_v28, %v1355_v32 }
0x16d8   : > { %v1360_v49 = vsel %vm1359_vm6, %v1704_v28, %v1356_v35 }
0x16d9   : > { %v1365_v36 = vsel %vm1362_vm5, %v1364_v34, %v1360_v49 }
0x16da   : > { %1368 = vperm.xlu0 %1702, %v1365_v36  }
0x174c   : > { %v1369_v38 = vpop.permute.xlu0 %1368 }
0x174d   : > { %v1371_v39 = vmul.f32 %v1369_v38, %v1351_v37 }
0x174f   : > { %1373 = vst.msk [vmem:[#allocation15] sm:$0x3] %vm1372_vm2, %v1371_v39 }
0x1750 PF: > { %s2337_s10 = sadd.s32 4294967295, %s1881_s12   ;;  %s1384_s14 = sshll.u32 %s2325_s8, 4  ;;  %s1385_s14 = int_to_ptr.hbm [resolvable:$true] %s1384_s14 }
0x1751   : > { %p1552_p4 = scmp.eq.s32.totalorder %s2337_s10, 1  ;;  %s1896_s18 = smov [#allocation15]  }
0x1752   : > { %s1382_s15 = sshll.u32 %s1896_s18, 4  ;;  %s1383_s15 = int_to_ptr.vmem [resolvable:$true] %s1382_s15 }
0x1753   : > { %1533 = dma.vmem_to_hbm [thread:$0]  (%p1552_p4), %s1383_s15, 32, %s1385_s14, [#allocation11]  }
0x1754   : > { %1856 = dma.done.wait (%p1552_p4), [#allocation11], 32  }
0x1755   : > { %1858 = vsyncadd (%p1552_p4), [#allocation11], 4294967264 }
0x1756 PF: > { %s24_s12 = sadd.s32 1, %s1881_s12   ;;  %s2338_s29 = smov %s1865_s30 }
0x1757   : > { %p21_p5 = scmp.ge.s32.totalorder %s24_s12, 4   ;;  %s2339_s30 = smov %s1869_s9 }
0x1758   : > { %s2340_s9 = smov %s2020_s21  ;;  %s2341_s10 = smov %s1877_s11 }
0x1759   : > { %s2342_s11 = smov %s2344_s28  ;;  %23 = sbr.rel (!%p21_p5) target bundleno = 10 (0xa), region = 123 }
0x175e   :  { %1398 = vsyncpa [#allocation10], 1 }
0x175f   :  { %1400 = vsyncpa [#allocation10 + $0x1], 1 }
0x1760   :  { %1401 = vsyncpa [#allocation13], 1 }
0x1761   :  { %1402 = vsyncpa [#allocation11], 1 }
0x1762   :  { %1404 = vsyncpa [#allocation11 + $0x1], 1 }

</bundles_post_ra>
